<compile_context>
chip_gen: v5e
topology: v5e:2x2
jax: 0.10.0
libtpu: 0.0.40
codegen_flags: <defaults>
</compile_context>

<pallas_src>
import functools

import jax
import jax.numpy as jnp
from jax.experimental import pallas as pl
from jax.experimental.pallas import tpu as pltpu


def _round_up(x, m):
    return ((x + m - 1) // m) * m


def _disc_kernel(neg_slope,
                 emb_ref, w1_ref, b1_ref, w2_ref, b2_ref, w3_ref, b3_ref,
                 lab_ref,
                 logp_ref, pred_ref, ploss_ref):
    # neg_slope is a plain Python float baked in at trace time (no captured array).
    # In-kernel bf16 cast: free VPU filler, avoids a wrapper-side convert pass.
    x = emb_ref[...].astype(jnp.bfloat16)                          # [tb, D]

    # ---- layer 1: Linear(D -> H1p) + LeakyReLU (bf16 MXU operands, f32 accumulate) ----
    h1 = jnp.dot(x, w1_ref[...], preferred_element_type=jnp.float32) + b1_ref[...]
    h1 = jnp.where(h1 >= 0, h1, neg_slope * h1)

    # ---- layer 2: Linear(H1p -> H2p) + LeakyReLU (padded lanes stay exactly 0) ----
    h2 = jnp.dot(h1.astype(jnp.bfloat16), w2_ref[...],
                 preferred_element_type=jnp.float32) + b2_ref[...]
    h2 = jnp.where(h2 >= 0, h2, neg_slope * h2)

    # ---- layer 3: Linear(H2p -> C_pad); padded class columns carry bias -1e30 ----
    scores = jnp.dot(h2.astype(jnp.bfloat16), w3_ref[...],
                     preferred_element_type=jnp.float32) + b3_ref[...]

    # ---- log_softmax along dim=1 (padded columns contribute exp(-huge) == 0) ----
    m = jnp.max(scores, axis=1, keepdims=True)
    shifted = scores - m
    lse = jnp.log(jnp.sum(jnp.exp(shifted), axis=1, keepdims=True))
    logp = shifted - lse
    logp_ref[...] = logp.astype(logp_ref.dtype)

    tb, cp = logp_ref.shape
    col = jax.lax.broadcasted_iota(jnp.int32, (tb, cp), 1)

    # ---- prediction: argmax over classes, first-index tie-break (torch .max(1)) ----
    # XLU lane reduce has slack in this mem-bound kernel; padded cols can't win.
    pred_ref[...] = jnp.min(jnp.where(scores == m, col, jnp.int32(cp)),
                            axis=1, keepdims=True)

    # ---- per-tile partial NLL sum: -sum_i logp[i, labels[i]] (mean in wrapper) ----
    onehot = (col == lab_ref[...]).astype(jnp.float32)             # labels < C < C_pad
    ploss_ref[0, 0] = -jnp.sum(onehot * logp)


def _pick_tile_b(batch, d, c_pad, budget_bytes=48 << 20):
    """Largest batch tile whose double-buffered I/O streams fit the budget.

    NOTE: on v7x (2 TensorCores) prefer a tile <= batch // 2 so the "parallel"
    batch axis can shard across both cores; on v5e/v6e one fat tile is best.
    """
    for t in (2048, 1024, 512, 256, 128, 64, 32, 16, 8):
        if batch % t == 0 and 2 * t * (d + c_pad + 2) * 4 <= budget_bytes:
            return t
    return batch


def _vmem_limit_bytes(tile_b, d, h1p, h2p, c_pad):
    """Shape-aware scoped-VMEM limit (resident weights single-buffered)."""
    weights = (d * h1p + h1p * h2p + h2p * c_pad) * 2      # bf16, single-buffered
    biases = (h1p + h2p + c_pad) * 4                        # f32
    streams = 2 * tile_b * (d + c_pad + 2) * 4              # double-buffered I/O tiles
    # TODO(synk): when bf16 w1 alone nears the per-generation VMEM budget
    # (embed_dim >~ 4K on v5e/v6e, ~2.5-3K on v7x), K-tile layer-1 weights
    # (extra grid axis / pltpu.emit_pipeline) instead of only raising the limit.
    limit = int((weights + biases + streams) * 1.5) + (8 << 20)
    return max(32 << 20, min(limit, 100 << 20))


def prepare_params(params):
    """One-time (off the hot path) bf16 cast + lane-dense zero padding of weights.

    Hidden widths and the class dim are padded up to multiples of 128 so every
    matmul output is lane-dense (no masked partial stores). Padding is exact:
    padded weight rows/cols and biases are zero, except the padded class
    columns whose bias is -1e30 so they never win softmax / argmax.
    """
    w1, b1, w2, b2, w3, b3 = params
    d, h1 = w1.shape
    h2 = w2.shape[1]
    c = w3.shape[1]
    h1p = max(128, _round_up(h1, 128))
    h2p = max(128, _round_up(h2, 128))
    c_pad = max(128, _round_up(c, 128))
    bf = jnp.bfloat16
    w1p = jnp.zeros((d, h1p), bf).at[:, :h1].set(w1.astype(bf))
    b1p = jnp.zeros((1, h1p), jnp.float32).at[:, :h1].set(b1.reshape(1, h1))
    w2p = jnp.zeros((h1p, h2p), bf).at[:h1, :h2].set(w2.astype(bf))
    b2p = jnp.zeros((1, h2p), jnp.float32).at[:, :h2].set(b2.reshape(1, h2))
    w3p = jnp.zeros((h2p, c_pad), bf).at[:h2, :c].set(w3.astype(bf))
    b3p = jnp.full((1, c_pad), -1e30, jnp.float32).at[:, :c].set(b3.reshape(1, c))
    return {"w1": w1p, "b1": b1p, "w2": w2p, "b2": b2p, "w3": w3p, "b3": b3p,
            "num_class": c}


def multiclass_discriminator_forward(embeddings, labels, prepared, neg_slope,
                                     tile_b=None, logp_dtype=jnp.float32):
    """Returns (loss [scalar], log_softmax output [B, C], prediction [B, 1])."""
    w1, b1 = prepared["w1"], prepared["b1"]
    w2, b2 = prepared["w2"], prepared["b2"]
    w3, b3 = prepared["w3"], prepared["b3"]
    num_class = prepared["num_class"]

    B, D = embeddings.shape
    c_pad = w3.shape[1]

    if tile_b is None:
        tile_b = _pick_tile_b(B, D, c_pad)
    assert B % tile_b == 0, (B, tile_b)
    assert tile_b == B or tile_b % 8 == 0, tile_b   # (8,128) sublane constraint
    n_tiles = B // tile_b

    labels2d = labels.reshape(B, 1).astype(jnp.int32)
    kernel = functools.partial(_disc_kernel, float(neg_slope))

    def resident(shape):
        # Grid-invariant weights/biases: single-buffer so the resident footprint
        # stays inside v7x's 64 MiB VMEM at large embed_dim.
        try:
            return pl.BlockSpec(shape, lambda i: (0, 0),
                                pipeline_mode=pl.Buffered(1))
        except TypeError:  # jax without pipeline_mode kwarg: default buffering
            return pl.BlockSpec(shape, lambda i: (0, 0))

    vmem_limit = _vmem_limit_bytes(tile_b, D, w1.shape[1], w2.shape[1], c_pad)

    logp_pad, pred, ploss = pl.pallas_call(
        kernel,
        out_shape=(
            jax.ShapeDtypeStruct((B, c_pad), logp_dtype),   # padded log_softmax
            jax.ShapeDtypeStruct((B, 1), jnp.int32),        # prediction (argmax)
            jax.ShapeDtypeStruct((n_tiles, 1), jnp.float32),  # per-tile NLL sums
        ),
        grid_spec=pltpu.PrefetchScalarGridSpec(
            num_scalar_prefetch=0,
            grid=(n_tiles,),
            in_specs=[
                pl.BlockSpec((tile_b, D), lambda i: (i, 0)),     # embeddings tile
                resident(w1.shape), resident(b1.shape),
                resident(w2.shape), resident(b2.shape),
                resident(w3.shape), resident(b3.shape),
                pl.BlockSpec((tile_b, 1), lambda i: (i, 0)),     # labels tile
            ],
            out_specs=(
                pl.BlockSpec((tile_b, c_pad), lambda i: (i, 0)),
                pl.BlockSpec((tile_b, 1), lambda i: (i, 0)),
                pl.BlockSpec((1, 1), lambda i: (i, 0), memory_space=pltpu.SMEM),
            ),
        ),
        compiler_params=pltpu.CompilerParams(
            dimension_semantics=("parallel",),
            vmem_limit_bytes=vmem_limit,
        ),
    )(embeddings, w1, b1, w2, b2, w3, b3, labels2d)

    logp = logp_pad[:, :num_class]
    loss = jnp.sum(ploss) / jnp.float32(B)
    return loss, logp, pred


def init_params(key, embed_dim, out_dim):
    """Deterministic init matching MulticlassDiscriminator.init_weights:
    normal(mean=0, std=0.01) for weights and biases; weights stored [in, out]."""
    h1, h2 = embed_dim // 2, embed_dim // 4
    ks = jax.random.split(key, 6)
    std = 0.01
    w1 = std * jax.random.normal(ks[0], (embed_dim, h1), jnp.float32)
    b1 = std * jax.random.normal(ks[1], (1, h1), jnp.float32)
    w2 = std * jax.random.normal(ks[2], (h1, h2), jnp.float32)
    b2 = std * jax.random.normal(ks[3], (1, h2), jnp.float32)
    w3 = std * jax.random.normal(ks[4], (h2, out_dim), jnp.float32)
    b3 = std * jax.random.normal(ks[5], (1, out_dim), jnp.float32)
    return (w1, b1, w2, b2, w3, b3)


def _reference(embeddings, labels, params, neg_slope):
    """Pure-JAX reference with matching bf16-operand / f32-accumulate precision."""
    w1, b1, w2, b2, w3, b3 = params
    bf = jnp.bfloat16
    lrelu = lambda v: jnp.where(v >= 0, v, neg_slope * v)
    h = lrelu(jnp.dot(embeddings.astype(bf), w1.astype(bf),
                      preferred_element_type=jnp.float32) + b1)
    h = lrelu(jnp.dot(h.astype(bf), w2.astype(bf),
                      preferred_element_type=jnp.float32) + b2)
    scores = jnp.dot(h.astype(bf), w3.astype(bf),
                     preferred_element_type=jnp.float32) + b3
    logp = jax.nn.log_softmax(scores, axis=1)
    loss = -jnp.mean(jnp.take_along_axis(logp, labels[:, None], axis=1))
    pred = jnp.argmax(logp, axis=1, keepdims=True)
    return loss, logp, pred


if __name__ == "__main__":
    # Shapes consistent with the module: attacker MLP over user embeddings.
    B = 128          # batch of embeddings
    EMBED_DIM = 32   # embedding_size
    NUM_CLASS = 4    # feature_info.num_class
    NEG_SLOPE = 0.2  # config['neg_slope']

    key = jax.random.PRNGKey(0)
    k_emb, k_lab, k_par = jax.random.split(key, 3)
    embeddings = jax.random.normal(k_emb, (B, EMBED_DIM), jnp.float32)
    labels = jax.random.randint(k_lab, (B,), 0, NUM_CLASS, jnp.int32)
    params = init_params(k_par, EMBED_DIM, NUM_CLASS)

    # One-time weight prep (bf16 + lane-dense padding) outside the hot path.
    prepared = prepare_params(params)

    # Auto-picked tile_b: B=128 -> single 128-row tile (one grid step).
    loss, logp, pred = multiclass_discriminator_forward(
        embeddings, labels, prepared, NEG_SLOPE)
    jax.block_until_ready((loss, logp, pred))

    # sanity check against pure-JAX reference (same precision recipe)
    ref_loss, ref_logp, ref_pred = _reference(embeddings, labels, params, NEG_SLOPE)
    assert jnp.allclose(loss, ref_loss, atol=1e-4), (float(loss), float(ref_loss))
    assert jnp.allclose(logp, ref_logp, atol=1e-4), float(jnp.max(jnp.abs(logp - ref_logp)))
    # prediction must match except where the reference itself has a near-tie
    top2 = jax.lax.top_k(ref_logp, 2)[0]
    near_tie = (top2[:, 0] - top2[:, 1]) < 1e-3
    pred_ok = (pred[:, 0] == ref_pred.astype(jnp.int32)[:, 0]) | near_tie
    assert bool(jnp.all(pred_ok))

    print("KERNEL_OK")
</pallas_src>

<mosaic_0001>
module attributes {stable_mosaic.version = 11 : i64} {
  func.func @_disc_kernel(%arg0: i32, %arg1: memref<128x32xf32, #tpu.memory_space<vmem>>, %arg2: memref<32x128xbf16, #tpu.memory_space<vmem>>, %arg3: memref<1x128xf32, #tpu.memory_space<vmem>>, %arg4: memref<128x128xbf16, #tpu.memory_space<vmem>>, %arg5: memref<1x128xf32, #tpu.memory_space<vmem>>, %arg6: memref<128x128xbf16, #tpu.memory_space<vmem>>, %arg7: memref<1x128xf32, #tpu.memory_space<vmem>>, %arg8: memref<128x1xi32, #tpu.memory_space<vmem>>, %arg9: memref<128x128xf32, #tpu.memory_space<vmem>>, %arg10: memref<128x1xi32, #tpu.memory_space<vmem>>, %arg11: memref<1x1xf32, #tpu.memory_space<smem>>) attributes {dimension_semantics = [#tpu.dimension_semantics<parallel>], iteration_bounds = array<i64: 1>, scalar_prefetch = 0 : i64, scratch_operands = 0 : i64, tpu.core_type = #tpu.core_type<tc>, window_params = [{transform_indices = @transform_0, window_bounds = array<i64: 128, 32>}, {pipeline_mode = #tpu.pipeline_mode<synchronous>, transform_indices = @transform_1, window_bounds = array<i64: 32, 128>}, {pipeline_mode = #tpu.pipeline_mode<synchronous>, transform_indices = @transform_2, window_bounds = array<i64: 1, 128>}, {pipeline_mode = #tpu.pipeline_mode<synchronous>, transform_indices = @transform_3, window_bounds = array<i64: 128, 128>}, {pipeline_mode = #tpu.pipeline_mode<synchronous>, transform_indices = @transform_4, window_bounds = array<i64: 1, 128>}, {pipeline_mode = #tpu.pipeline_mode<synchronous>, transform_indices = @transform_5, window_bounds = array<i64: 128, 128>}, {pipeline_mode = #tpu.pipeline_mode<synchronous>, transform_indices = @transform_6, window_bounds = array<i64: 1, 128>}, {transform_indices = @transform_7, window_bounds = array<i64: 128, 1>}, {transform_indices = @transform_8, window_bounds = array<i64: 128, 128>}, {transform_indices = @transform_9, window_bounds = array<i64: 128, 1>}, {transform_indices = @transform_10, window_bounds = array<i64: 1, 1>}]} {
    %c0 = arith.constant 0 : index
    %c0_0 = arith.constant 0 : index
    %0 = vector.load %arg1[%c0, %c0_0] : memref<128x32xf32, #tpu.memory_space<vmem>>, vector<128x32xf32>
    %1 = arith.truncf %0 : vector<128x32xf32> to vector<128x32xbf16>
    %c0_1 = arith.constant 0 : index
    %c0_2 = arith.constant 0 : index
    %2 = vector.load %arg2[%c0_1, %c0_2] : memref<32x128xbf16, #tpu.memory_space<vmem>>, vector<32x128xbf16>
    %cst = arith.constant dense<0.000000e+00> : vector<128x128xf32>
    %3 = tpu.matmul %1, %2, %cst {dimension_numbers = #tpu.dot_dimension_numbers<[1], [0], [0], [1], [0, 0, 1, 1], [], []>} : vector<128x32xbf16>, vector<32x128xbf16>, vector<128x128xf32> -> vector<128x128xf32>
    %c0_3 = arith.constant 0 : index
    %c0_4 = arith.constant 0 : index
    %4 = vector.load %arg3[%c0_3, %c0_4] : memref<1x128xf32, #tpu.memory_space<vmem>>, vector<1x128xf32>
    %5 = vector.broadcast %4 : vector<1x128xf32> to vector<128x128xf32>
    %6 = arith.addf %3, %5 : vector<128x128xf32>
    %cst_5 = arith.constant 0.000000e+00 : f32
    %7 = vector.broadcast %cst_5 : f32 to vector<128x128xf32>
    %8 = arith.cmpf oge, %6, %7 : vector<128x128xf32>
    %cst_6 = arith.constant 2.000000e-01 : f32
    %9 = vector.broadcast %cst_6 : f32 to vector<128x128xf32>
    %10 = arith.mulf %9, %6 : vector<128x128xf32>
    %11 = arith.select %8, %6, %10 : vector<128x128xi1>, vector<128x128xf32>
    %12 = arith.truncf %11 : vector<128x128xf32> to vector<128x128xbf16>
    %c0_7 = arith.constant 0 : index
    %c0_8 = arith.constant 0 : index
    %13 = vector.load %arg4[%c0_7, %c0_8] : memref<128x128xbf16, #tpu.memory_space<vmem>>, vector<128x128xbf16>
    %cst_9 = arith.constant dense<0.000000e+00> : vector<128x128xf32>
    %14 = tpu.matmul %12, %13, %cst_9 {dimension_numbers = #tpu.dot_dimension_numbers<[1], [0], [0], [1], [0, 0, 1, 1], [], []>} : vector<128x128xbf16>, vector<128x128xbf16>, vector<128x128xf32> -> vector<128x128xf32>
    %c0_10 = arith.constant 0 : index
    %c0_11 = arith.constant 0 : index
    %15 = vector.load %arg5[%c0_10, %c0_11] : memref<1x128xf32, #tpu.memory_space<vmem>>, vector<1x128xf32>
    %16 = vector.broadcast %15 : vector<1x128xf32> to vector<128x128xf32>
    %17 = arith.addf %14, %16 : vector<128x128xf32>
    %cst_12 = arith.constant 0.000000e+00 : f32
    %18 = vector.broadcast %cst_12 : f32 to vector<128x128xf32>
    %19 = arith.cmpf oge, %17, %18 : vector<128x128xf32>
    %cst_13 = arith.constant 2.000000e-01 : f32
    %20 = vector.broadcast %cst_13 : f32 to vector<128x128xf32>
    %21 = arith.mulf %20, %17 : vector<128x128xf32>
    %22 = arith.select %19, %17, %21 : vector<128x128xi1>, vector<128x128xf32>
    %23 = arith.truncf %22 : vector<128x128xf32> to vector<128x128xbf16>
    %c0_14 = arith.constant 0 : index
    %c0_15 = arith.constant 0 : index
    %24 = vector.load %arg6[%c0_14, %c0_15] : memref<128x128xbf16, #tpu.memory_space<vmem>>, vector<128x128xbf16>
    %cst_16 = arith.constant dense<0.000000e+00> : vector<128x128xf32>
    %25 = tpu.matmul %23, %24, %cst_16 {dimension_numbers = #tpu.dot_dimension_numbers<[1], [0], [0], [1], [0, 0, 1, 1], [], []>} : vector<128x128xbf16>, vector<128x128xbf16>, vector<128x128xf32> -> vector<128x128xf32>
    %c0_17 = arith.constant 0 : index
    %c0_18 = arith.constant 0 : index
    %26 = vector.load %arg7[%c0_17, %c0_18] : memref<1x128xf32, #tpu.memory_space<vmem>>, vector<1x128xf32>
    %27 = vector.broadcast %26 : vector<1x128xf32> to vector<128x128xf32>
    %28 = arith.addf %25, %27 : vector<128x128xf32>
    %cst_19 = arith.constant dense<0xFF800000> : vector<128xf32>
    %29 = vector.multi_reduction <maximumf>, %28, %cst_19 [1] : vector<128x128xf32> to vector<128xf32>
    %30 = vector.shape_cast %29 : vector<128xf32> to vector<128x1xf32>
    %31 = vector.broadcast %30 : vector<128x1xf32> to vector<128x128xf32>
    %32 = arith.subf %28, %31 : vector<128x128xf32>
    %33 = math.exp %32 : vector<128x128xf32>
    %cst_20 = arith.constant dense<0.000000e+00> : vector<128xf32>
    %34 = vector.multi_reduction <add>, %33, %cst_20 [1] : vector<128x128xf32> to vector<128xf32>
    %35 = vector.shape_cast %34 : vector<128xf32> to vector<128x1xf32>
    %36 = math.log %35 : vector<128x1xf32>
    %37 = vector.broadcast %36 : vector<128x1xf32> to vector<128x128xf32>
    %38 = arith.subf %32, %37 : vector<128x128xf32>
    %c0_21 = arith.constant 0 : index
    %c0_22 = arith.constant 0 : index
    %39 = vector.load %arg9[%c0_21, %c0_22] : memref<128x128xf32, #tpu.memory_space<vmem>>, vector<128x128xf32>
    tpu.vector_store %arg9[%c0_21, %c0_22], %38 {strides = array<i32>} : memref<128x128xf32, #tpu.memory_space<vmem>>, vector<128x128xf32>,
    %40 = tpu.iota {dimensions = array<i32: 1>} : vector<128x128xi32>
    %41 = vector.broadcast %30 : vector<128x1xf32> to vector<128x128xf32>
    %42 = arith.cmpf oeq, %28, %41 : vector<128x128xf32>
    %c128_i32 = arith.constant 128 : i32
    %43 = vector.broadcast %c128_i32 : i32 to vector<128x128xi32>
    %44 = arith.select %42, %40, %43 : vector<128x128xi1>, vector<128x128xi32>
    %cst_23 = arith.constant dense<2147483647> : vector<128xi32>
    %45 = vector.multi_reduction <minsi>, %44, %cst_23 [1] : vector<128x128xi32> to vector<128xi32>
    %46 = vector.shape_cast %45 : vector<128xi32> to vector<128x1xi32>
    %c0_24 = arith.constant 0 : index
    %c0_25 = arith.constant 0 : index
    %47 = vector.load %arg10[%c0_24, %c0_25] : memref<128x1xi32, #tpu.memory_space<vmem>>, vector<128x1xi32>
    tpu.vector_store %arg10[%c0_24, %c0_25], %46 {strides = array<i32>} : memref<128x1xi32, #tpu.memory_space<vmem>>, vector<128x1xi32>,
    %c0_26 = arith.constant 0 : index
    %c0_27 = arith.constant 0 : index
    %48 = vector.load %arg8[%c0_26, %c0_27] : memref<128x1xi32, #tpu.memory_space<vmem>>, vector<128x1xi32>
    %49 = vector.broadcast %48 : vector<128x1xi32> to vector<128x128xi32>
    %50 = arith.cmpi eq, %40, %49 : vector<128x128xi32>
    %51 = arith.extui %50 : vector<128x128xi1> to vector<128x128xi32>
    %52 = arith.sitofp %51 : vector<128x128xi32> to vector<128x128xf32>
    %53 = arith.mulf %52, %38 : vector<128x128xf32>
    %54 = vector.shape_cast %53 : vector<128x128xf32> to vector<1x128x128xf32>
    %cst_28 = arith.constant dense<0.000000e+00> : vector<1xf32>
    %55 = vector.multi_reduction <add>, %54, %cst_28 [1, 2] : vector<1x128x128xf32> to vector<1xf32>
    %56 = vector.shape_cast %55 : vector<1xf32> to vector<1x1x1xf32>
    %57 = vector.extract %56[0, 0, 0] : f32 from vector<1x1x1xf32>
    %cst_29 = arith.constant 0.000000e+00 : f32
    %58 = arith.subf %cst_29, %57 : f32
    %c0_30 = arith.constant 0 : index
    %c0_31 = arith.constant 0 : index
    %59 = memref.load %arg11[%c0_30, %c0_31] : memref<1x1xf32, #tpu.memory_space<smem>>
    memref.store %58, %arg11[%c0_30, %c0_31] : memref<1x1xf32, #tpu.memory_space<smem>>
    return
  }
  func.func @transform_0(%arg0: i32) -> (i32, i32) {
    %c0_i32 = arith.constant 0 : i32
    %c0_i32_0 = arith.constant 0 : i32
    return %arg0, %c0_i32 : i32, i32
  }
  func.func @transform_1(%arg0: i32) -> (i32, i32) {
    %c0_i32 = arith.constant 0 : i32
    %c0_i32_0 = arith.constant 0 : i32
    %c0_i32_1 = arith.constant 0 : i32
    return %c0_i32, %c0_i32_0 : i32, i32
  }
  func.func @transform_2(%arg0: i32) -> (i32, i32) {
    %c0_i32 = arith.constant 0 : i32
    %c0_i32_0 = arith.constant 0 : i32
    %c0_i32_1 = arith.constant 0 : i32
    return %c0_i32, %c0_i32_0 : i32, i32
  }
  func.func @transform_3(%arg0: i32) -> (i32, i32) {
    %c0_i32 = arith.constant 0 : i32
    %c0_i32_0 = arith.constant 0 : i32
    %c0_i32_1 = arith.constant 0 : i32
    return %c0_i32, %c0_i32_0 : i32, i32
  }
  func.func @transform_4(%arg0: i32) -> (i32, i32) {
    %c0_i32 = arith.constant 0 : i32
    %c0_i32_0 = arith.constant 0 : i32
    %c0_i32_1 = arith.constant 0 : i32
    return %c0_i32, %c0_i32_0 : i32, i32
  }
  func.func @transform_5(%arg0: i32) -> (i32, i32) {
    %c0_i32 = arith.constant 0 : i32
    %c0_i32_0 = arith.constant 0 : i32
    %c0_i32_1 = arith.constant 0 : i32
    return %c0_i32, %c0_i32_0 : i32, i32
  }
  func.func @transform_6(%arg0: i32) -> (i32, i32) {
    %c0_i32 = arith.constant 0 : i32
    %c0_i32_0 = arith.constant 0 : i32
    %c0_i32_1 = arith.constant 0 : i32
    return %c0_i32, %c0_i32_0 : i32, i32
  }
  func.func @transform_7(%arg0: i32) -> (i32, i32) {
    %c0_i32 = arith.constant 0 : i32
    %c0_i32_0 = arith.constant 0 : i32
    return %arg0, %c0_i32 : i32, i32
  }
  func.func @transform_8(%arg0: i32) -> (i32, i32) {
    %c0_i32 = arith.constant 0 : i32
    %c0_i32_0 = arith.constant 0 : i32
    return %arg0, %c0_i32 : i32, i32
  }
  func.func @transform_9(%arg0: i32) -> (i32, i32) {
    %c0_i32 = arith.constant 0 : i32
    %c0_i32_0 = arith.constant 0 : i32
    return %arg0, %c0_i32 : i32, i32
  }
  func.func @transform_10(%arg0: i32) -> (i32, i32) {
    %c0_i32 = arith.constant 0 : i32
    %c0_i32_0 = arith.constant 0 : i32
    return %arg0, %c0_i32 : i32, i32
  }
}

</mosaic_0001>

<bundles_post_ra>
// kernel: tpu_custom_call.1
= control target key start
LH: loop header
LB: loop body
LE: loop exit
PB: predicated region body
PF: predicated region fallthrough
CT: control target
= control target key end

     0   :  { %16 = vsyncpa [#allocation3], 0  ;;  %s2205_s0 = inlined_call_operand.vmem [shape: f32[128,32], index: 0, kind: input, shape index: {}]   ;;  %s2206_s1 = inlined_call_operand.vmem [shape: bf16[32,128], index: 1, kind: input, shape index: {}]   ;;  %s2207_s2 = inlined_call_operand.vmem [shape: f32[1,128], index: 2, kind: input, shape index: {}]   ;;  %s2208_s3 = inlined_call_operand.vmem [shape: bf16[128,128], index: 3, kind: input, shape index: {}]   ;;  %s2209_s4 = inlined_call_operand.vmem [shape: f32[1,128], index: 4, kind: input, shape index: {}]   ;;  %s2210_s5 = inlined_call_operand.vmem [shape: bf16[128,128], index: 5, kind: input, shape index: {}]   ;;  %s2211_s6 = inlined_call_operand.vmem [shape: f32[1,128], index: 6, kind: input, shape index: {}]   ;;  %s2212_s7 = inlined_call_operand.vmem [shape: s32[128,1], index: 7, kind: input, shape index: {}]   ;;  %s2213_s8 = inlined_call_operand.hbm [shape: f32[128,128], index: 8, kind: output, shape index: {0}]   ;;  %s2214_s9 = inlined_call_operand.vmem [shape: s32[128,1], index: 9, kind: output, shape index: {1}]   ;;  %s2215_s10 = inlined_call_operand.hbm [shape: f32[1,1], index: 10, kind: output, shape index: {2}]  }
   0x1   :  { %v1239_v0 = vld [vmem:[%s2206_s1 + $0x8] sm:$0xff]  ;;  %v1238_v1 = vld [vmem:[%s2206_s1] sm:$0xff] }
   0x2   :  { %110 = vmatpush.bf16.msra.mxu0 %v1239_v0  ;;  %v35_v2 = vld [vmem:[%s2205_s0] sm:$0xff]  ;;  %v36_v3 = vld [vmem:[%s2205_s0 + $0x8] sm:$0xff] }
   0x3   :  { %17 = vsyncpa [#allocation4], 0  ;;  %v51_v4 = vpack.c.bf16 %v36_v3, %v35_v2  ;;  %vm79_vm0 = vcmask 261120   ;;  %v37_v5 = vld [vmem:[%s2205_s0 + $0x10] sm:$0xff]  ;;  %v38_v6 = vld [vmem:[%s2205_s0 + $0x18] sm:$0xff]  ;;  %s1392_s11 = smov [#allocation2]  }
   0x4   :  { %v52_v7 = vpack.c.bf16 %v38_v6, %v37_v5  ;;  %v39_v8 = vld [vmem:[%s2205_s0 + $0x20] sm:$0xff]  ;;  %v40_v9 = vld [vmem:[%s2205_s0 + $0x28] sm:$0xff]  ;;  %v41_v11 = vld [vmem:[%s2205_s0 + $0x30] sm:$0xff]  ;;  %s1109_s12 = sshll.u32 %s1392_s11, 4  ;;  %s1111_s15 = sshll.u32 %s2213_s8, 4  ;;  %s1110_s12 = int_to_ptr.vmem [resolvable:$true] %s1109_s12  ;;  %s1112_s15 = int_to_ptr.hbm [resolvable:$true] %s1111_s15 }
   0x5   :  { %v53_v10 = vpack.c.bf16 %v40_v9, %v39_v8  ;;  %v42_v12 = vld [vmem:[%s2205_s0 + $0x38] sm:$0xff]  ;;  %v43_v14 = vld [vmem:[%s2205_s0 + $0x40] sm:$0xff]  ;;  %v44_v15 = vld [vmem:[%s2205_s0 + $0x48] sm:$0xff]  ;;  %s1393_s16 = smov 128   ;;  %s1394_s17 = smov 8  }
   0x6   :  { %111 = vmatpush.bf16.msra.mxu0 %v1238_v1  ;;  %v54_v13 = vpack.c.bf16 %v42_v12, %v41_v11  ;;  %v55_v16 = vpack.c.bf16 %v44_v15, %v43_v14  ;;  %v1247_v17 = vld [vmem:[%s2208_s3 + $0x38] sm:$0xff]  ;;  %v45_v18 = vld [vmem:[%s2205_s0 + $0x50] sm:$0xff]  ;;  %v1245_v22 = vld [vmem:[%s2208_s3 + $0x28] sm:$0xff]  ;;  %s1395_s26 = smov [#allocation5]  }
   0x7   :  { %277 = vmatpush.bf16.msra.mxu1 %v1247_v17  ;;  %1256 = vmatpush.bf16.msra.mxu3 %v1247_v17  ;;  %v46_v19 = vld [vmem:[%s2205_s0 + $0x58] sm:$0xff]  ;;  %v1246_v21 = vld [vmem:[%s2208_s3 + $0x30] sm:$0xff]  ;;  %v1244_v23 = vld [vmem:[%s2208_s3 + $0x20] sm:$0xff] }
   0x8   :  { %v56_v20 = vpack.c.bf16 %v46_v19, %v45_v18  ;;  %v47_v24 = vld [vmem:[%s2205_s0 + $0x60] sm:$0xff]  ;;  %v48_v25 = vld [vmem:[%s2205_s0 + $0x68] sm:$0xff]  ;;  %v1243_v27 = vld [vmem:[%s2208_s3 + $0x18] sm:$0xff] }
   0x9   :  { %1150 = vmatmul.msk.bf16.vlgmr.msra.gmra.mxu0 %vm79_vm0, %v51_v4  ;;  %v57_v26 = vpack.c.bf16 %v48_v25, %v47_v24  ;;  %v1242_v28 = vld [vmem:[%s2208_s3 + $0x10] sm:$0xff]  ;;  %v1241_v29 = vld [vmem:[%s2208_s3 + $0x8] sm:$0xff]  ;;  %v1240_v30 = vld [vmem:[%s2208_s3] sm:$0xff] }
   0xa   :  { %v49_v31 = vld [vmem:[%s2205_s0 + $0x70] sm:$0xff]  ;;  %v50_v32 = vld [vmem:[%s2205_s0 + $0x78] sm:$0xff]  ;;  %v1540_v35 = vld [vmem:[%s2207_s2] ss:$0 sm:$0xff]  ;;  %s1125_s0 = sshll.u32 %s2215_s10, 4  ;;  %s1126_s0 = int_to_ptr.hbm [resolvable:$true] %s1125_s0 }
   0xb   :  { %278 = vmatpush.bf16.msra.mxu1 %v1246_v21  ;;  %1257 = vmatpush.bf16.msra.mxu3 %v1246_v21  ;;  %v58_v33 = vpack.c.bf16 %v50_v32, %v49_v31 }
   0xf   :  { %279 = vmatpush.bf16.msra.mxu1 %v1245_v22  ;;  %1258 = vmatpush.bf16.msra.mxu3 %v1245_v22  ;;  %v1255_v22 = vld [vmem:[%s2210_s5 + $0x38] sm:$0xff] }
  0x10   :  { %450 = vmatpush.bf16.msra.mxu2 %v1255_v22 }
  0x13   :  { %280 = vmatpush.bf16.msra.mxu1 %v1244_v23  ;;  %1259 = vmatpush.bf16.msra.mxu3 %v1244_v23 }
  0x17   :  { %281 = vmatpush.bf16.msra.mxu1 %v1243_v27  ;;  %1260 = vmatpush.bf16.msra.mxu3 %v1243_v27  ;;  %v1254_v27 = vld [vmem:[%s2210_s5 + $0x30] sm:$0xff] }
  0x18   :  { %451 = vmatpush.bf16.msra.mxu2 %v1254_v27 }
  0x19   :  { %1151 = vmatmul.msk.bf16.gmra.mxu0 %vm79_vm0, %v52_v7 }
  0x1b   :  { %282 = vmatpush.bf16.msra.mxu1 %v1242_v28  ;;  %1261 = vmatpush.bf16.msra.mxu3 %v1242_v28  ;;  %v1253_v28 = vld [vmem:[%s2210_s5 + $0x28] sm:$0xff] }
  0x1c   :  { %452 = vmatpush.bf16.msra.mxu2 %v1253_v28 }
  0x1f   :  { %283 = vmatpush.bf16.msra.mxu1 %v1241_v29  ;;  %1262 = vmatpush.bf16.msra.mxu3 %v1241_v29 }
  0x23   :  { %284 = vmatpush.bf16.msra.mxu1 %v1240_v30  ;;  %1263 = vmatpush.bf16.msra.mxu3 %v1240_v30  ;;  %v1252_v30 = vld [vmem:[%s2210_s5 + $0x20] sm:$0xff] }
  0x24   :  { %453 = vmatpush.bf16.msra.mxu2 %v1252_v30 }
  0x27   :  { %1264 = vmatpush.bf16.msrb.mxu3 %v1255_v22 }
  0x29   :  { %1152 = vmatmul.msk.bf16.gmra.mxu0 %vm79_vm0, %v53_v10 }
  0x2b   :  { %1265 = vmatpush.bf16.msrb.mxu3 %v1254_v27 }
  0x2f   :  { %1266 = vmatpush.bf16.msrb.mxu3 %v1253_v28  ;;  %v952_v28 = vld [vmem:[%s2212_s7 + $0x10] sm:$0xff] }
  0x33   :  { %1267 = vmatpush.bf16.msrb.mxu3 %v1252_v30 }
  0x39   :  { %1153 = vmatmul.msk.bf16.gmra.mxu0 %vm79_vm0, %v54_v13 }
  0x49   :  { %1154 = vmatmul.msk.bf16.gmra.mxu0 %vm79_vm0, %v55_v16 }
  0x59   :  { %1155 = vmatmul.msk.bf16.gmra.mxu0 %vm79_vm0, %v56_v20 }
  0x69   :  { %1156 = vmatmul.msk.bf16.gmra.mxu0 %vm79_vm0, %v57_v26 }
  0x79   :  { %1157 = vmatmul.msk.bf16.gmra.mxu0 %vm79_vm0, %v58_v33 }
  0x86   :  { %v113_v34 = vpop.f32.mrf.mxu0 }
  0x87   :  { %v114_v36 = vadd.f32 %v1540_v35, %v113_v34 }
  0x89   :  { %v169_v38 = vmul.f32 0.2, %v114_v36  ;;  %vm153_vm1 = vcmp.ge.f32.partialorder %v114_v36, 0.0 }
  0x8b   :  { %v185_v41 = vsel %vm153_vm1, %v114_v36, %v169_v38  ;;  %v1251_v36 = vld [vmem:[%s2210_s5 + $0x18] sm:$0xff] }
  0x8c   :  { %454 = vmatpush.bf16.msra.mxu2 %v1251_v36  ;;  %1268 = vmatpush.bf16.msrb.mxu3 %v1251_v36  ;;  %v955_v36 = vld [vmem:[%s2212_s7 + $0x28] sm:$0xff] }
  0x8e   :  { %v115_v37 = vpop.f32.mrf.mxu0 }
  0x8f   :  { %v116_v39 = vadd.f32 %v1540_v35, %v115_v37 }
  0x91   :  { %v170_v40 = vmul.f32 0.2, %v116_v39  ;;  %vm154_vm2 = vcmp.ge.f32.partialorder %v116_v39, 0.0 }
  0x93   :  { %v186_v42 = vsel %vm154_vm2, %v116_v39, %v170_v40 }
  0x94   :  { %v201_v43 = vpack.c.bf16 %v186_v42, %v185_v41  ;;  %v1250_v41 = vld [vmem:[%s2210_s5 + $0x10] sm:$0xff]  ;;  %v1249_v42 = vld [vmem:[%s2210_s5 + $0x8] sm:$0xff] }
  0x95   :  { %455 = vmatpush.bf16.msra.mxu2 %v1250_v41  ;;  %1269 = vmatpush.bf16.msrb.mxu3 %v1250_v41 }
  0x96   :  { %v118_v44 = vpop.f32.mrf.mxu0  ;;  %285 = vmatmul.bf16.vlgmr.msra.gmra.mxu1 %v201_v43 }
  0x97   :  { %v119_v45 = vadd.f32 %v1540_v35, %v118_v44 }
  0x99   :  { %v171_v47 = vmul.f32 0.2, %v119_v45  ;;  %vm155_vm3 = vcmp.ge.f32.partialorder %v119_v45, 0.0  ;;  %456 = vmatpush.bf16.msra.mxu2 %v1249_v42  ;;  %1270 = vmatpush.bf16.msrb.mxu3 %v1249_v42 }
  0x9b   :  { %v187_v50 = vsel %vm155_vm3, %v119_v45, %v171_v47  ;;  %v1248_v45 = vld [vmem:[%s2210_s5] sm:$0xff] }
  0x9d   :  { %457 = vmatpush.bf16.msra.mxu2 %v1248_v45  ;;  %1271 = vmatpush.bf16.msrb.mxu3 %v1248_v45 }
  0x9e   :  { %v120_v46 = vpop.f32.mrf.mxu0 }
  0x9f   :  { %v121_v48 = vadd.f32 %v1540_v35, %v120_v46 }
  0xa1   :  { %v172_v49 = vmul.f32 0.2, %v121_v48  ;;  %vm156_vm4 = vcmp.ge.f32.partialorder %v121_v48, 0.0 }
  0xa3   :  { %v188_v51 = vsel %vm156_vm4, %v121_v48, %v172_v49 }
  0xa4   :  { %v202_v52 = vpack.c.bf16 %v188_v51, %v187_v50 }
  0xa6   :  { %v123_v53 = vpop.f32.mrf.mxu0  ;;  %290 = vmatmul.bf16.gmra.mxu1 %v202_v52 }
  0xa7   :  { %v124_v54 = vadd.f32 %v1540_v35, %v123_v53  ;;  %v1585_v53 = vld [vmem:[%s2209_s4] ss:$0 sm:$0xff] }
  0xa9   :  { %v173_v56 = vmul.f32 0.2, %v124_v54  ;;  %vm157_vm5 = vcmp.ge.f32.partialorder %v124_v54, 0.0 }
  0xab   :  { %v189_v59 = vsel %vm157_vm5, %v124_v54, %v173_v56 }
  0xae   :  { %v125_v55 = vpop.f32.mrf.mxu0 }
  0xaf   :  { %v126_v57 = vadd.f32 %v1540_v35, %v125_v55 }
  0xb1   :  { %v174_v58 = vmul.f32 0.2, %v126_v57  ;;  %vm158_vm6 = vcmp.ge.f32.partialorder %v126_v57, 0.0 }
  0xb3   :  { %v190_v60 = vsel %vm158_vm6, %v126_v57, %v174_v58 }
  0xb4   :  { %v203_v61 = vpack.c.bf16 %v190_v60, %v189_v59 }
  0xb6   :  { %v128_v62 = vpop.f32.mrf.mxu0  ;;  %295 = vmatmul.bf16.gmra.mxu1 %v203_v61 }
  0xb7   :  { %v129_v63 = vadd.f32 %v1540_v35, %v128_v62 }
  0xb9   :  { %v175_v1 = vmul.f32 0.2, %v129_v63  ;;  %vm159_vm7 = vcmp.ge.f32.partialorder %v129_v63, 0.0 }
  0xbb   :  { %v191_v4 = vsel %vm159_vm7, %v129_v63, %v175_v1 }
  0xbe   :  { %v130_v0 = vpop.f32.mrf.mxu0 }
  0xbf   :  { %v131_v2 = vadd.f32 %v1540_v35, %v130_v0 }
  0xc1   :  { %v176_v3 = vmul.f32 0.2, %v131_v2  ;;  %vm160_vm8 = vcmp.ge.f32.partialorder %v131_v2, 0.0 }
  0xc3   :  { %v192_v5 = vsel %vm160_vm8, %v131_v2, %v176_v3 }
  0xc4   :  { %v204_v6 = vpack.c.bf16 %v192_v5, %v191_v4 }
  0xc6   :  { %v133_v7 = vpop.f32.mrf.mxu0  ;;  %300 = vmatmul.bf16.gmra.mxu1 %v204_v6 }
  0xc7   :  { %v134_v8 = vadd.f32 %v1540_v35, %v133_v7 }
  0xc9   :  { %v177_v10 = vmul.f32 0.2, %v134_v8  ;;  %vm161_vm9 = vcmp.ge.f32.partialorder %v134_v8, 0.0 }
  0xcb   :  { %v193_v13 = vsel %vm161_vm9, %v134_v8, %v177_v10 }
  0xce   :  { %v135_v9 = vpop.f32.mrf.mxu0 }
  0xcf   :  { %v136_v11 = vadd.f32 %v1540_v35, %v135_v9 }
  0xd1   :  { %v178_v12 = vmul.f32 0.2, %v136_v11  ;;  %vm162_vm10 = vcmp.ge.f32.partialorder %v136_v11, 0.0 }
  0xd3   :  { %v194_v14 = vsel %vm162_vm10, %v136_v11, %v178_v12 }
  0xd4   :  { %v205_v15 = vpack.c.bf16 %v194_v14, %v193_v13 }
  0xd6   :  { %v138_v16 = vpop.f32.mrf.mxu0  ;;  %305 = vmatmul.bf16.gmra.mxu1 %v205_v15 }
  0xd7   :  { %v139_v17 = vadd.f32 %v1540_v35, %v138_v16  ;;  %v951_v16 = vld [vmem:[%s2212_s7 + $0x8] sm:$0xff] }
  0xd9   :  { %v179_v19 = vmul.f32 0.2, %v139_v17  ;;  %vm163_vm11 = vcmp.ge.f32.partialorder %v139_v17, 0.0 }
  0xdb   :  { %v195_v23 = vsel %vm163_vm11, %v139_v17, %v179_v19  ;;  %v1390_v17 = vmov 0  }
  0xdc   :  { %1281 = vset.pattern.permute.xlu0 %v1390_v17  ;;  %1282 = vset.pattern.permute.xlu1 %v1390_v17 }
  0xdd   :  { %970 = vperm.xlu0 %1281, %v951_v16   ;;  %1280 = vset.pattern.permute.xlu2 %v1390_v17 }
  0xde   :  { %v140_v18 = vpop.f32.mrf.mxu0  ;;  %973 = vperm.xlu1 %1282, %v952_v28  }
  0xdf   :  { %v141_v20 = vadd.f32 %v1540_v35, %v140_v18 }
  0xe1   :  { %v180_v21 = vmul.f32 0.2, %v141_v20  ;;  %vm164_vm12 = vcmp.ge.f32.partialorder %v141_v20, 0.0 }
  0xe3   :  { %v196_v24 = vsel %vm164_vm12, %v141_v20, %v180_v21 }
  0xe4   :  { %v206_v25 = vpack.c.bf16 %v196_v24, %v195_v23  ;;  %v958_v23 = vld [vmem:[%s2212_s7 + $0x40] sm:$0xff] }
  0xe5   :  { %991 = vperm.xlu0 %1281, %v958_v23  }
  0xe6   :  { %v143_v26 = vpop.f32.mrf.mxu0  ;;  %310 = vmatmul.bf16.gmra.mxu1 %v206_v25  ;;  %982 = vperm.xlu1 %1282, %v955_v36  }
  0xe7   :  { %v144_v29 = vadd.f32 %v1540_v35, %v143_v26 }
  0xe9   :  { %v181_v32 = vmul.f32 0.2, %v144_v29  ;;  %vm165_vm13 = vcmp.ge.f32.partialorder %v144_v29, 0.0 }
  0xeb   :  { %v197_v37 = vsel %vm165_vm13, %v144_v29, %v181_v32  ;;  %v950_v29 = vld [vmem:[%s2212_s7] sm:$0xff] }
  0xec   :  { %967 = vperm.xlu2 %1280, %v950_v29  }
  0xee   :  { %v145_v31 = vpop.f32.mrf.mxu0 }
  0xef   :  { %v146_v33 = vadd.f32 %v1540_v35, %v145_v31  ;;  %v961_v31 = vld [vmem:[%s2212_s7 + $0x58] sm:$0xff] }
  0xf0   :  { %1000 = vperm.xlu0 %1281, %v961_v31  }
  0xf1   :  { %v182_v34 = vmul.f32 0.2, %v146_v33  ;;  %vm166_vm14 = vcmp.ge.f32.partialorder %v146_v33, 0.0 }
  0xf3   :  { %v198_v38 = vsel %vm166_vm14, %v146_v33, %v182_v34 }
  0xf4   :  { %v207_v39 = vpack.c.bf16 %v198_v38, %v197_v37  ;;  %v953_v37 = vld [vmem:[%s2212_s7 + $0x18] sm:$0xff] }
  0xf5   :  { %976 = vperm.xlu2 %1280, %v953_v37  }
  0xf6   :  { %v148_v40 = vpop.f32.mrf.mxu0  ;;  %315 = vmatmul.bf16.vlgmr.msra.gmra.mxu3 %v207_v39 }
  0xf7   :  { %v149_v43 = vadd.f32 %v1540_v35, %v148_v40 }
  0xf9   :  { %v183_v46 = vmul.f32 0.2, %v149_v43  ;;  %vm167_vm15 = vcmp.ge.f32.partialorder %v149_v43, 0.0 }
  0xfb   :  { %v199_v49 = vsel %vm167_vm15, %v149_v43, %v183_v46  ;;  %v957_v43 = vld [vmem:[%s2212_s7 + $0x38] sm:$0xff] }
  0xfc   :  { %988 = vperm.xlu1 %1282, %v957_v43  }
  0xfe   :  { %v150_v44 = vpop.f32.mrf.mxu0 }
  0xff   :  { %v151_v47 = vadd.f32 %v1540_v35, %v150_v44  ;;  %v954_v44 = vld [vmem:[%s2212_s7 + $0x20] sm:$0xff] }
 0x100   :  { %979 = vperm.xlu2 %1280, %v954_v44  }
 0x101   :  { %v184_v48 = vmul.f32 0.2, %v151_v47  ;;  %vm168_vm0 = vcmp.ge.f32.partialorder %v151_v47, 0.0 }
 0x103   :  { %v200_v50 = vsel %vm168_vm0, %v151_v47, %v184_v48 }
 0x104   :  { %v208_v51 = vpack.c.bf16 %v200_v50, %v199_v49  ;;  %v960_v49 = vld [vmem:[%s2212_s7 + $0x50] sm:$0xff] }
 0x105   :  { %v956_v50 = vld [vmem:[%s2212_s7 + $0x30] sm:$0xff]  ;;  %997 = vperm.xlu1 %1282, %v960_v49  }
 0x106   :  { %320 = vmatmul.bf16.gmra.mxu3 %v208_v51 }
 0x108   :  { %985 = vperm.xlu2 %1280, %v956_v50  }
 0x113   :  { %v286_v52 = vpop.f32.mrf.mxu1 }
 0x114   :  { %v287_v54 = vadd.f32 %v1585_v53, %v286_v52 }
 0x116   :  { %v342_v56 = vmul.f32 0.2, %v287_v54  ;;  %vm326_vm1 = vcmp.ge.f32.partialorder %v287_v54, 0.0 }
 0x118   :  { %v358_v58 = vsel %vm326_vm1, %v287_v54, %v342_v56  ;;  %v959_v56 = vld [vmem:[%s2212_s7 + $0x48] sm:$0xff] }
 0x119   :  { %994 = vperm.xlu2 %1280, %v959_v56  }
 0x11b   :  { %v288_v55 = vpop.f32.mrf.mxu1 }
 0x11c   :  { %v289_v35 = vadd.f32 %v1585_v53, %v288_v55 }
 0x11e   :  { %v343_v57 = vmul.f32 0.2, %v289_v35  ;;  %vm327_vm2 = vcmp.ge.f32.partialorder %v289_v35, 0.0 }
 0x120   :  { %v359_v59 = vsel %vm327_vm2, %v289_v35, %v343_v57  ;;  %v962_v57 = vld [vmem:[%s2212_s7 + $0x60] sm:$0xff] }
 0x121   :  { %v374_v60 = vpack.c.bf16 %v359_v59, %v358_v58  ;;  %1003 = vperm.xlu2 %1280, %v962_v57  }
 0x123   :  { %v291_v61 = vpop.f32.mrf.mxu1  ;;  %458 = vmatmul.bf16.vlgmr.msra.gmra.mxu2 %v374_v60 }
 0x124   :  { %v292_v62 = vadd.f32 %v1585_v53, %v291_v61 }
 0x126   :  { %v344_v0 = vmul.f32 0.2, %v292_v62  ;;  %vm328_vm3 = vcmp.ge.f32.partialorder %v292_v62, 0.0 }
 0x128   :  { %v360_v3 = vsel %vm328_vm3, %v292_v62, %v344_v0 }
 0x12b   :  { %v293_v63 = vpop.f32.mrf.mxu1 }
 0x12c   :  { %v294_v1 = vadd.f32 %v1585_v53, %v293_v63 }
 0x12e   :  { %v345_v2 = vmul.f32 0.2, %v294_v1  ;;  %vm329_vm4 = vcmp.ge.f32.partialorder %v294_v1, 0.0 }
 0x130   :  { %v361_v4 = vsel %vm329_vm4, %v294_v1, %v345_v2 }
 0x131   :  { %v375_v5 = vpack.c.bf16 %v361_v4, %v360_v3 }
 0x133   :  { %v296_v6 = vpop.f32.mrf.mxu1  ;;  %463 = vmatmul.bf16.gmra.mxu2 %v375_v5 }
 0x134   :  { %v297_v7 = vadd.f32 %v1585_v53, %v296_v6 }
 0x136   :  { %v346_v9 = vmul.f32 0.2, %v297_v7  ;;  %vm330_vm5 = vcmp.ge.f32.partialorder %v297_v7, 0.0 }
 0x138   :  { %v362_v12 = vsel %vm330_vm5, %v297_v7, %v346_v9 }
 0x13b   :  { %v298_v8 = vpop.f32.mrf.mxu1 }
 0x13c   :  { %v299_v10 = vadd.f32 %v1585_v53, %v298_v8 }
 0x13e   :  { %v347_v11 = vmul.f32 0.2, %v299_v10  ;;  %vm331_vm6 = vcmp.ge.f32.partialorder %v299_v10, 0.0 }
 0x140   :  { %v363_v13 = vsel %vm331_vm6, %v299_v10, %v347_v11  ;;  %v1645_v11 = vld [vmem:[%s2211_s6] ss:$0 sm:$0xff] }
 0x141   :  { %v376_v14 = vpack.c.bf16 %v363_v13, %v362_v12 }
 0x143   :  { %v301_v15 = vpop.f32.mrf.mxu1  ;;  %468 = vmatmul.bf16.gmra.mxu2 %v376_v14 }
 0x144   :  { %v302_v18 = vadd.f32 %v1585_v53, %v301_v15 }
 0x146   :  { %v348_v20 = vmul.f32 0.2, %v302_v18  ;;  %vm332_vm7 = vcmp.ge.f32.partialorder %v302_v18, 0.0  ;;  %v1694_v37 = vpop.permute.xlu2 %967 }
 0x148   :  { %v364_v24 = vsel %vm332_vm7, %v302_v18, %v348_v20 }
 0x14b   :  { %v303_v19 = vpop.f32.mrf.mxu1 }
 0x14c   :  { %v304_v21 = vadd.f32 %v1585_v53, %v303_v19 }
 0x14e   :  { %v349_v22 = vmul.f32 0.2, %v304_v21  ;;  %vm333_vm8 = vcmp.ge.f32.partialorder %v304_v21, 0.0 }
 0x14f   :  { %v1691_v36 = vpop.permute.xlu0 %970 }
 0x150   :  { %v365_v25 = vsel %vm333_vm8, %v304_v21, %v349_v22 }
 0x151   :  { %v377_v26 = vpack.c.bf16 %v365_v25, %v364_v24 }
 0x153   :  { %v306_v27 = vpop.f32.mrf.mxu1  ;;  %473 = vmatmul.bf16.gmra.mxu2 %v377_v26 }
 0x154   :  { %v307_v30 = vadd.f32 %v1585_v53, %v306_v27 }
 0x156   :  { %v350_v33 = vmul.f32 0.2, %v307_v30  ;;  %vm334_vm9 = vcmp.ge.f32.partialorder %v307_v30, 0.0 }
 0x158   :  { %v366_v39 = vsel %vm334_vm9, %v307_v30, %v350_v33 }
 0x15b   :  { %v308_v32 = vpop.f32.mrf.mxu1 }
 0x15c   :  { %v309_v34 = vadd.f32 %v1585_v53, %v308_v32 }
 0x15e   :  { %v351_v38 = vmul.f32 0.2, %v309_v34  ;;  %vm335_vm10 = vcmp.ge.f32.partialorder %v309_v34, 0.0 }
 0x160   :  { %v367_v40 = vsel %vm335_vm10, %v309_v34, %v351_v38  ;;  %v1696_v38 = vpop.permute.xlu1 %973 }
 0x161   :  { %v378_v41 = vpack.c.bf16 %v367_v40, %v366_v39  ;;  %v1698_v39 = vpop.permute.xlu0 %991  ;;  %v1700_v40 = vpop.permute.xlu2 %976 }
 0x163   :  { %v311_v42 = vpop.f32.mrf.mxu1  ;;  %478 = vmatmul.bf16.gmra.mxu2 %v378_v41 }
 0x164   :  { %v312_v45 = vadd.f32 %v1585_v53, %v311_v42 }
 0x166   :  { %v352_v47 = vmul.f32 0.2, %v312_v45  ;;  %vm336_vm11 = vcmp.ge.f32.partialorder %v312_v45, 0.0 }
 0x168   :  { %v368_v52 = vsel %vm336_vm11, %v312_v45, %v352_v47  ;;  %v1705_v43 = vpop.permute.xlu1 %982 }
 0x169   :  { %v1708_v44 = vpop.permute.xlu0 %1000  ;;  %v1713_v47 = vpop.permute.xlu2 %979 }
 0x16a   :  { %2225 = vst [vmem:[#allocation10_spill] sm:$0xff] %v1708_v44 }
 0x16b   :  { %v313_v46 = vpop.f32.mrf.mxu1 }
 0x16c   :  { %v314_v48 = vadd.f32 %v1585_v53, %v313_v46 }
 0x16e   :  { %v353_v51 = vmul.f32 0.2, %v314_v48  ;;  %vm337_vm12 = vcmp.ge.f32.partialorder %v314_v48, 0.0 }
 0x170   :  { %v369_v54 = vsel %vm337_vm12, %v314_v48, %v353_v51  ;;  %v675_v48 = vlaneseq  ;;  %v1716_v49 = vpop.permute.xlu1 %988 }
 0x171   :  { %v379_v55 = vpack.c.bf16 %v369_v54, %v368_v52  ;;  %v1730_v57 = vpop.permute.xlu2 %985 }
 0x172   :  { %v1718_v50 = vand.u32 127, %v675_v48 }
 0x173   :  { %483 = vmatmul.bf16.gmra.mxu2 %v379_v55 }
 0x174   :  { %vm1014_vm8 = vcmp.eq.s32.totalorder %v1718_v50, %v1694_v37  ;;  %vm1015_vm11 = vcmp.eq.s32.totalorder %v1718_v50, %v1691_v36  ;;  %vm1016_vm12 = vcmp.eq.s32.totalorder %v1718_v50, %v1696_v38  ;;  %v964_v36 = vld [vmem:[%s2212_s7 + $0x70] sm:$0xff]  ;;  %v965_v38 = vld [vmem:[%s2212_s7 + $0x78] sm:$0xff] }
 0x179   :  { %v316_v35 = vpop.f32.mrf.mxu3 }
 0x17a   :  { %v317_v58 = vadd.f32 %v1585_v53, %v316_v35 }
 0x17c   :  { %v354_v60 = vmul.f32 0.2, %v317_v58  ;;  %vm338_vm13 = vcmp.ge.f32.partialorder %v317_v58, 0.0 }
 0x17e   :  { %v370_v63 = vsel %vm338_vm13, %v317_v58, %v354_v60  ;;  %vm1017_vm13 = vcmp.eq.s32.totalorder %v1718_v50, %v1700_v40 }
 0x181   :  { %v318_v59 = vpop.f32.mrf.mxu3 }
 0x182   :  { %v319_v61 = vadd.f32 %v1585_v53, %v318_v59  ;;  %v1733_v59 = vpop.permute.xlu1 %997 }
 0x184   :  { %vm339_vm14 = vcmp.ge.f32.partialorder %v319_v61, 0.0  ;;  %v355_v62 = vmul.f32 0.2, %v319_v61 }
 0x186   :  { %v371_v0 = vsel %vm339_vm14, %v319_v61, %v355_v62  ;;  %vm1018_vm14 = vcmp.eq.s32.totalorder %v1718_v50, %v1713_v47 }
 0x187   :  { %v380_v1 = vpack.c.bf16 %v371_v0, %v370_v63 }
 0x189   :  { %v321_v2 = vpop.f32.mrf.mxu3  ;;  %488 = vmatmul.bf16.vlgmr.msrb.gmra.mxu3 %v380_v1 }
 0x18a   :  { %v322_v3 = vadd.f32 %v1585_v53, %v321_v2 }
 0x18c   :  { %v356_v5 = vmul.f32 0.2, %v322_v3  ;;  %vm340_vm15 = vcmp.ge.f32.partialorder %v322_v3, 0.0 }
 0x18e   :  { %v372_v8 = vsel %vm340_vm15, %v322_v3, %v356_v5  ;;  %vm1019_vm15 = vcmp.eq.s32.totalorder %v1718_v50, %v1705_v43 }
 0x191   :  { %v323_v4 = vpop.f32.mrf.mxu3 }
 0x192   :  { %v324_v6 = vadd.f32 %v1585_v53, %v323_v4  ;;  %v1750_v4 = vpop.permute.xlu2 %994 }
 0x194   :  { %v357_v7 = vmul.f32 0.2, %v324_v6  ;;  %vm341_vm0 = vcmp.ge.f32.partialorder %v324_v6, 0.0 }
 0x196   :  { %v373_v9 = vsel %vm341_vm0, %v324_v6, %v357_v7  ;;  %vm1020_vm0 = vcmp.eq.s32.totalorder %v1718_v50, %v1730_v57 }
 0x197   :  { %v381_v10 = vpack.c.bf16 %v373_v9, %v372_v8 }
 0x199   :  { %493 = vmatmul.bf16.gmra.mxu3 %v381_v10 }
 0x1a6   :  { %v459_v12 = vpop.f32.mrf.mxu2 }
 0x1a7   :  { %v460_v13 = vadd.f32 %v1645_v11, %v459_v12 }
 0x1a9   :  { %499 = vmax.xlane.f32.xlu0 %v460_v13 }
 0x1ae   :  { %v461_v14 = vpop.f32.mrf.mxu2 }
 0x1af   :  { %v1649_v15 = vadd.f32 %v1645_v11, %v461_v14  ;;  %v1768_v14 = vpop.permute.xlu2 %1003 }
 0x1b0   :  { %2227 = vst [vmem:[#allocation12_spill] sm:$0xff] %v1768_v14 }
 0x1b1   :  { %501 = vmax.xlane.f32.xlu0 %v1649_v15 }
 0x1b6   :  { %v464_v53 = vpop.f32.mrf.mxu2 }
 0x1b7   :  { %v1653_v16 = vadd.f32 %v1645_v11, %v464_v53 }
 0x1b9   :  { %503 = vmax.xlane.f32.xlu1 %v1653_v16 }
 0x1be   :  { %v466_v17 = vpop.f32.mrf.mxu2 }
 0x1bf   :  { %v1657_v18 = vadd.f32 %v1645_v11, %v466_v17 }
 0x1c1   :  { %505 = vmax.xlane.f32.xlu1 %v1657_v18 }
 0x1c6   :  { %v469_v19 = vpop.f32.mrf.mxu2 }
 0x1c7   :  { %v1661_v20 = vadd.f32 %v1645_v11, %v469_v19 }
 0x1c9   :  { %507 = vmax.xlane.f32.xlu2 %v1661_v20 }
 0x1ce   :  { %v471_v21 = vpop.f32.mrf.mxu2 }
 0x1cf   :  { %v1665_v22 = vadd.f32 %v1645_v11, %v471_v21 }
 0x1d1   :  { %509 = vmax.xlane.f32.xlu2 %v1665_v22 }
 0x1d6   :  { %v474_v23 = vpop.f32.mrf.mxu2 }
 0x1d7   :  { %v1669_v24 = vadd.f32 %v1645_v11, %v474_v23 }
 0x1d9   :  { %511 = vmax.xlane.f32.xlu0 %v1669_v24 }
 0x1de   :  { %v476_v25 = vpop.f32.mrf.mxu2 }
 0x1df   :  { %v1673_v26 = vadd.f32 %v1645_v11, %v476_v25 }
 0x1e1   :  { %513 = vmax.xlane.f32.xlu1 %v1673_v26 }
 0x1e6   :  { %v479_v27 = vpop.f32.mrf.mxu2 }
 0x1e7   :  { %v1677_v28 = vadd.f32 %v1645_v11, %v479_v27 }
 0x1e9   :  { %2223 = vst [vmem:[#allocation8_spill] sm:$0xff] %v1677_v28  ;;  %515 = vmax.xlane.f32.xlu2 %v1677_v28 }
 0x1ee   :  { %v481_v29 = vpop.f32.mrf.mxu2 }
 0x1ef   :  { %v1681_v30 = vadd.f32 %v1645_v11, %v481_v29 }
 0x1f1   :  { %517 = vmax.xlane.f32.xlu0 %v1681_v30 }
 0x1f6   :  { %v484_v31 = vpop.f32.mrf.mxu2 }
 0x1f7   :  { %v1685_v32 = vadd.f32 %v1645_v11, %v484_v31 }
 0x1f9   :  { %519 = vmax.xlane.f32.xlu1 %v1685_v32 }
 0x1fe   :  { %v486_v33 = vpop.f32.mrf.mxu2 }
 0x1ff   :  { %v1689_v34 = vadd.f32 %v1645_v11, %v486_v33 }
 0x201   :  { %2224 = vst [vmem:[#allocation9_spill] sm:$0xff] %v1689_v34  ;;  %521 = vmax.xlane.f32.xlu2 %v1689_v34 }
 0x20c   :  { %v489_v41 = vpop.f32.mrf.mxu3 }
 0x20d   :  { %v1703_v42 = vadd.f32 %v1645_v11, %v489_v41 }
 0x20f   :  { %523 = vmax.xlane.f32.xlu0 %v1703_v42 }
 0x214   :  { %v491_v45 = vpop.f32.mrf.mxu3 }
 0x215   :  { %v1711_v46 = vadd.f32 %v1645_v11, %v491_v45 }
 0x217   :  { %525 = vmax.xlane.f32.xlu1 %v1711_v46 }
 0x21c   :  { %v494_v51 = vpop.f32.mrf.mxu3  ;;  %v500_v52 = vpop.xlane.xlu0 %499 }
 0x21d   :  { %v1721_v54 = vadd.f32 %v1645_v11, %v494_v51  ;;  %v1723_v55 = vsub.f32 %v460_v13, %v500_v52  ;;  %vm677_vm1 = vcmp.eq.f32.partialorder %v460_v13, %v500_v52 }
 0x21e   :  { %v1726_v56 = vsel %vm677_vm1, %v1718_v50, 128 }
 0x21f   :  { %2226 = vst [vmem:[#allocation11_spill] sm:$0xff] %v1721_v54  ;;  %v547_v35 = vmul.f32 1.442695, %v1723_v55  ;;  %527 = vmax.xlane.f32.xlu2 %v1721_v54  ;;  %v710_v58 = vshra.s32 %v1726_v56, 16 }
 0x221   :  { %1286 = vpow2.f32 %v547_v35  ;;  %v1742_v0 = vcvt.s32.f32 %v710_v58 }
 0x224   :  { %v496_v60 = vpop.f32.mrf.mxu3  ;;  %v502_v61 = vpop.xlane.xlu0 %501 }
 0x225   :  { %v1736_v62 = vadd.f32 %v1645_v11, %v496_v60  ;;  %v1739_v63 = vsub.f32 %v1649_v15, %v502_v61  ;;  %vm678_vm2 = vcmp.eq.f32.partialorder %v1649_v15, %v502_v61 }
 0x226   :  { %v1746_v3 = vsel %vm678_vm2, %v1718_v50, 128  ;;  %vm1021_vm2 = vcmp.eq.s32.totalorder %v1718_v50, %v1716_v49 }
 0x227   :  { %v1287_v1 = vpop.eup %1286  ;;  %v549_v2 = vmul.f32 1.442695, %v1739_v63  ;;  %529 = vmax.xlane.f32.xlu0 %v1736_v62  ;;  %713 = vmin.xlane.f32.xlu2 %v1742_v0  ;;  %v724_v5 = vshra.s32 %v1746_v3, 16 }
 0x228   :  { %579 = vadd.xlane.f32.xlu1 %v1287_v1 }
 0x229   :  { %1288 = vpow2.f32 %v549_v2  ;;  %v1760_v9 = vcvt.s32.f32 %v724_v5 }
 0x22c   :  { %v504_v6 = vpop.xlane.xlu1 %503 }
 0x22d   :  { %v1754_v7 = vsub.f32 %v1653_v16, %v504_v6  ;;  %vm679_vm3 = vcmp.eq.f32.partialorder %v1653_v16, %v504_v6 }
 0x22e   :  { %v1758_v8 = vsel %vm679_vm3, %v1718_v50, 128 }
 0x22f   :  { %v1289_v10 = vpop.eup %1288  ;;  %v738_v11 = vshra.s32 %v1758_v8, 16  ;;  %v551_v12 = vmul.f32 1.442695, %v1754_v7 }
 0x230   :  { %727 = vmin.xlane.f32.xlu1 %v1760_v9  ;;  %581 = vadd.xlane.f32.xlu2 %v1289_v10 }
 0x231   :  { %v1765_v13 = vcvt.s32.f32 %v738_v11  ;;  %1290 = vpow2.f32 %v551_v12 }
 0x233   :  { %741 = vmin.xlane.f32.xlu0 %v1765_v13 }
 0x234   :  { %v506_v15 = vpop.xlane.xlu1 %505 }
 0x235   :  { %v1771_v53 = vsub.f32 %v1657_v18, %v506_v15  ;;  %vm680_vm4 = vcmp.eq.f32.partialorder %v1657_v18, %v506_v15 }
 0x236   :  { %v1775_v16 = vsel %vm680_vm4, %v1718_v50, 128  ;;  %vm1022_vm4 = vcmp.eq.s32.totalorder %v1718_v50, %v1698_v39 }
 0x237   :  { %v553_v17 = vmul.f32 1.442695, %v1771_v53  ;;  %v752_v19 = vshra.s32 %v1775_v16, 16  ;;  %v1291_v23 = vpop.eup %1290 }
 0x239   :  { %1292 = vpow2.f32 %v553_v17  ;;  %v1779_v21 = vcvt.s32.f32 %v752_v19 }
 0x23b   :  { %583 = vadd.xlane.f32.xlu0 %v1291_v23  ;;  %755 = vmin.xlane.f32.xlu2 %v1779_v21 }
 0x23c   :  { %v508_v25 = vpop.xlane.xlu2 %507 }
 0x23d   :  { %v1783_v27 = vsub.f32 %v1661_v20, %v508_v25  ;;  %vm681_vm5 = vcmp.eq.f32.partialorder %v1661_v20, %v508_v25 }
 0x23e   :  { %v1788_v31 = vsel %vm681_vm5, %v1718_v50, 128 }
 0x23f   :  { %v1293_v18 = vpop.eup %1292  ;;  %v555_v29 = vmul.f32 1.442695, %v1783_v27  ;;  %v766_v33 = vshra.s32 %v1788_v31, 16 }
 0x240   :  { %585 = vadd.xlane.f32.xlu1 %v1293_v18 }
 0x241   :  { %1294 = vpow2.f32 %v555_v29  ;;  %v1798_v20 = vcvt.s32.f32 %v766_v33 }
 0x244   :  { %v510_v41 = vpop.xlane.xlu2 %509 }
 0x245   :  { %v1792_v45 = vsub.f32 %v1665_v22, %v510_v41  ;;  %vm682_vm6 = vcmp.eq.f32.partialorder %v1665_v22, %v510_v41 }
 0x246   :  { %v1796_v48 = vsel %vm682_vm6, %v1718_v50, 128 }
 0x247   :  { %v1295_v51 = vpop.eup %1294  ;;  %v780_v52 = vshra.s32 %v1796_v48, 16  ;;  %v557_v35 = vmul.f32 1.442695, %v1792_v45 }
 0x248   :  { %769 = vmin.xlane.f32.xlu1 %v1798_v20  ;;  %587 = vadd.xlane.f32.xlu2 %v1295_v51 }
 0x249   :  { %v1803_v58 = vcvt.s32.f32 %v780_v52  ;;  %1296 = vpow2.f32 %v557_v35 }
 0x24b   :  { %783 = vmin.xlane.f32.xlu0 %v1803_v58 }
 0x24c   :  { %v1806_v60 = vpop.xlane.xlu0 %511 }
 0x24d   :  { %v1810_v22 = vsub.f32 %v1669_v24, %v1806_v60  ;;  %vm683_vm1 = vcmp.eq.f32.partialorder %v1669_v24, %v1806_v60 }
 0x24f   :  { %v559_v61 = vmul.f32 1.442695, %v1810_v22  ;;  %v1297_v1 = vpop.eup %1296 }
 0x251   :  { %1298 = vpow2.f32 %v559_v61 }
 0x253   :  { %589 = vadd.xlane.f32.xlu0 %v1297_v1 }
 0x254   :  { %v1813_v2 = vpop.xlane.xlu1 %513 }
 0x255   :  { %v1817_v5 = vsub.f32 %v1673_v26, %v1813_v2  ;;  %vm684_vm3 = vcmp.eq.f32.partialorder %v1673_v26, %v1813_v2 }
 0x257   :  { %v1299_v6 = vpop.eup %1298  ;;  %v561_v10 = vmul.f32 1.442695, %v1817_v5 }
 0x258   :  { %591 = vadd.xlane.f32.xlu1 %v1299_v6 }
 0x259   :  { %1300 = vpow2.f32 %v561_v10 }
 0x25c   :  { %v1820_v11 = vpop.xlane.xlu2 %515 }
 0x25d   :  { %2228 = vst [vmem:[#allocation13_spill] sm:$0xff] %v1820_v11  ;;  %v1824_v12 = vsub.f32 %v1677_v28, %v1820_v11 }
 0x25f   :  { %v1301_v15 = vpop.eup %1300  ;;  %v563_v17 = vmul.f32 1.442695, %v1824_v12 }
 0x260   :  { %593 = vadd.xlane.f32.xlu2 %v1301_v15 }
 0x261   :  { %1302 = vpow2.f32 %v563_v17 }
 0x264   :  { %v1827_v19 = vpop.xlane.xlu0 %517 }
 0x265   :  { %v1831_v23 = vsub.f32 %v1681_v30, %v1827_v19 }
 0x267   :  { %v1303_v25 = vpop.eup %1302  ;;  %v565_v18 = vmul.f32 1.442695, %v1831_v23 }
 0x268   :  { %595 = vadd.xlane.f32.xlu0 %v1303_v25 }
 0x269   :  { %1304 = vpow2.f32 %v565_v18 }
 0x26c   :  { %v1834_v29 = vpop.xlane.xlu1 %519 }
 0x26d   :  { %v1838_v33 = vsub.f32 %v1685_v32, %v1834_v29  ;;  %vm687_vm5 = vcmp.eq.f32.partialorder %v1685_v32, %v1834_v29  ;;  %v779_v32 = vand.u32 65535, %v1796_v48 }
 0x26f   :  { %v1305_v41 = vpop.eup %1304  ;;  %v567_v51 = vmul.f32 1.442695, %v1838_v33 }
 0x270   :  { %597 = vadd.xlane.f32.xlu1 %v1305_v41 }
 0x271   :  { %1306 = vpow2.f32 %v567_v51 }
 0x274   :  { %v1841_v52 = vpop.xlane.xlu2 %521 }
 0x275   :  { %2229 = vst [vmem:[#allocation14_spill] sm:$0xff] %v1841_v52  ;;  %v1845_v35 = vsub.f32 %v1689_v34, %v1841_v52 }
 0x277   :  { %v1307_v61 = vpop.eup %1306  ;;  %v569_v1 = vmul.f32 1.442695, %v1845_v35 }
 0x278   :  { %599 = vadd.xlane.f32.xlu2 %v1307_v61 }
 0x279   :  { %1308 = vpow2.f32 %v569_v1 }
 0x27f   :  { %v1309_v6 = vpop.eup %1308 }
 0x280   :  { %601 = vadd.xlane.f32.xlu0 %v1309_v6 }
 0x282   :  { %v1848_v10 = vpop.xlane.xlu0 %523 }
 0x283   :  { %v1852_v15 = vsub.f32 %v1703_v42, %v1848_v10 }
 0x285   :  { %v571_v17 = vmul.f32 1.442695, %v1852_v15 }
 0x287   :  { %1310 = vpow2.f32 %v571_v17  ;;  %v709_v17 = vand.u32 65535, %v1726_v56  ;;  %v723_v56 = vand.u32 65535, %v1746_v3 }
 0x289   :  { %v711_v11 = vcvt.s32.f32 %v709_v17  ;;  %v737_v17 = vand.u32 65535, %v1758_v8 }
 0x28a   :  { %v1855_v25 = vpop.xlane.xlu1 %525 }
 0x28b   :  { %v1859_v18 = vsub.f32 %v1711_v46, %v1855_v25 }
 0x28d   :  { %v1311_v41 = vpop.eup %1310  ;;  %v573_v51 = vmul.f32 1.442695, %v1859_v18 }
 0x28e   :  { %603 = vadd.xlane.f32.xlu1 %v1311_v41 }
 0x28f   :  { %1312 = vpow2.f32 %v573_v51 }
 0x292   :  { %v1862_v61 = vpop.xlane.xlu2 %527 }
 0x293   :  { %2230 = vst [vmem:[#allocation15_spill] sm:$0xff] %v1862_v61  ;;  %v1866_v6 = vsub.f32 %v1721_v54, %v1862_v61 }
 0x295   :  { %v1313_v1 = vpop.eup %1312  ;;  %2231 = vst [vmem:[#allocation16_spill] sm:$0xff] %v1866_v6  ;;  %v575_v34 = vmul.f32 1.442695, %v1866_v6 }
 0x296   :  { %605 = vadd.xlane.f32.xlu2 %v1313_v1 }
 0x29a   :  { %v1870_v52 = vpop.xlane.xlu2 %713  ;;  %v1872_v28 = vpop.xlane.xlu0 %529 }
 0x29b   :  { %v1876_v41 = vsub.f32 %v1736_v62, %v1872_v28  ;;  %v580_v51 = vpop.xlane.xlu1 %579  ;;  %vm715_vm7 = vcmp.eq.f32.partialorder %v1742_v0, %v1870_v52  ;;  %v725_v0 = vcvt.s32.f32 %v723_v56 }
 0x29c   :  { %1314 = vlog2.f32 %v580_v51  ;;  %v716_v54 = vsel %vm715_vm7, %v711_v11, inf  ;;  %v1391_v11 = vmov 0.0   ;;  %vm1023_vm7 = vcmp.eq.s32.totalorder %v1718_v50, %v1750_v4 }
 0x29d   :  { %v577_v1 = vmul.f32 1.442695, %v1876_v41  ;;  %717 = vmin.xlane.f32.xlu0 %v716_v54  ;;  %1316 = vpow2.f32 %v575_v34  ;;  %v1222_v8 = vsel %vm1014_vm8, 1.0, %v1391_v11  ;;  %v1223_v56 = vsel %vm1015_vm11, 1.0, %v1391_v11 }
 0x29e   :  { %v1229_v60 = vsel %vm1021_vm2, 1.0, %v1391_v11  ;;  %vm686_vm8 = vcmp.eq.f32.partialorder %v1681_v30, %v1827_v19  ;;  %v1231_v4 = vsel %vm1023_vm7, 1.0, %v1391_v11  ;;  %v781_v19 = vcvt.s32.f32 %v779_v32 }
 0x29f   :  { %1318 = vpow2.f32 %v577_v1  ;;  %vm690_vm11 = vcmp.eq.f32.partialorder %v1711_v46, %v1855_v25 }
 0x2a2   :  { %v1315_v61 = vpop.eup %1314 }
 0x2a3   :  { %v612_v14 = vmul.f32 0.6931472, %v1315_v61  ;;  %v1885_v44 = vpop.xlane.xlu1 %727  ;;  %v582_v6 = vpop.xlane.xlu2 %581  ;;  %v739_v61 = vcvt.s32.f32 %v737_v17 }
 0x2a4   :  { %v1317_v51 = vpop.eup %1316  ;;  %1320 = vlog2.f32 %v582_v6  ;;  %vm729_vm9 = vcmp.eq.f32.partialorder %v1760_v9, %v1885_v44  ;;  %v734_v32 = vcvt.f32.s32 %v1885_v44 }
 0x2a5   :  { %v1319_v34 = vpop.eup %1318  ;;  %v643_v54 = vsub.f32 %v1723_v55, %v612_v14  ;;  %607 = vadd.xlane.f32.xlu0 %v1317_v51  ;;  %v730_v3 = vsel %vm729_vm9, %v725_v0, inf }
 0x2a6   :  { %731 = vmin.xlane.f32.xlu2 %v730_v3  ;;  %609 = vadd.xlane.f32.xlu1 %v1319_v34  ;;  %v1891_v37 = vpop.xlane.xlu0 %741 }
 0x2a7   :  { %659 = vst [vmem:[#allocation2] sm:$0xff] %v643_v54  ;;  %v1062_v1 = vmul.f32 %v1222_v8, %v643_v54  ;;  %vm743_vm10 = vcmp.eq.f32.partialorder %v1765_v13, %v1891_v37  ;;  %v1224_v8 = vsel %vm1016_vm12, 1.0, %v1391_v11  ;;  %vm1024_vm12 = vcmp.eq.s32.totalorder %v1718_v50, %v1733_v59 }
 0x2a8   :  { %v1895_v6 = vsel %vm743_vm10, %v739_v61, inf }
 0x2aa   :  { %v1321_v9 = vpop.eup %1320 }
 0x2ab   :  { %v614_v55 = vmul.f32 0.6931472, %v1321_v9 }
 0x2ad   :  { %v644_v14 = vsub.f32 %v1739_v63, %v614_v55 }
 0x2ae   :  { %v584_v0 = vpop.xlane.xlu0 %583  ;;  %v1901_v34 = vpop.xlane.xlu2 %755 }
 0x2af   :  { %660 = vst [vmem:[#allocation2 + $0x8] sm:$0xff] %v644_v14  ;;  %v1063_v51 = vmul.f32 %v1223_v56, %v644_v14  ;;  %1322 = vlog2.f32 %v584_v0  ;;  %v1225_v0 = vsel %vm1017_vm13, 1.0, %v1391_v11  ;;  %vm757_vm6 = vcmp.eq.f32.partialorder %v1779_v21, %v1901_v34 }
 0x2b0   :  { %vm689_vm13 = vcmp.eq.f32.partialorder %v1703_v42, %v1848_v10 }
 0x2b1   :  { %v1078_v17 = vadd.f32 %v1063_v51, %v1062_v1 }
 0x2b3   :  { %v586_v54 = vpop.xlane.xlu1 %585 }
 0x2b4   :  { %1324 = vlog2.f32 %v586_v54 }
 0x2b5   :  { %v1323_v13 = vpop.eup %1322 }
 0x2b6   :  { %v616_v3 = vmul.f32 0.6931472, %v1323_v13 }
 0x2b8   :  { %v645_v63 = vsub.f32 %v1754_v7, %v616_v3  ;;  %v963_v7 = vld [vmem:[%s2212_s7 + $0x68] sm:$0xff] }
 0x2b9   :  { %1009 = vperm.xlu0 %1281, %v964_v36  }
 0x2ba   :  { %v1325_v61 = vpop.eup %1324  ;;  %661 = vst [vmem:[#allocation2 + $0x10] sm:$0xff] %v645_v63  ;;  %v1064_v1 = vmul.f32 %v1224_v8, %v645_v63 }
 0x2bb   :  { %v618_v9 = vmul.f32 0.6931472, %v1325_v61  ;;  %v588_v55 = vpop.xlane.xlu2 %587 }
 0x2bc   :  { %v1079_v14 = vadd.f32 %v1078_v17, %v1064_v1  ;;  %1326 = vlog2.f32 %v588_v55  ;;  %v1924_v17 = vpop.xlane.xlu1 %769 }
 0x2bd   :  { %v646_v56 = vsub.f32 %v1771_v53, %v618_v9  ;;  %v1226_v53 = vsel %vm1018_vm14, 1.0, %v1391_v11  ;;  %vm771_vm9 = vcmp.eq.f32.partialorder %v1798_v20, %v1924_v17  ;;  %vm692_vm14 = vcmp.eq.f32.partialorder %v1736_v62, %v1872_v28 }
 0x2be   :  { %1012 = vperm.xlu2 %1280, %v965_v38   ;;  %v1920_v51 = vpop.xlane.xlu0 %783  ;;  %v1227_v38 = vsel %vm1019_vm15, 1.0, %v1391_v11  ;;  %vm933_vm15 = vcmask 7168  }
 0x2bf   :  { %662 = vst [vmem:[#allocation2 + $0x18] sm:$0xff] %v646_v56  ;;  %v1065_v40 = vmul.f32 %v1225_v0, %v646_v56  ;;  %1006 = vperm.xlu1 %1282, %v963_v7   ;;  %vm785_vm10 = vcmp.eq.f32.partialorder %v1803_v58, %v1920_v51 }
 0x2c1   :  { %v1080_v54 = vadd.f32 %v1079_v14, %v1065_v40 }
 0x2c2   :  { %v1327_v13 = vpop.eup %1326 }
 0x2c3   :  { %v620_v3 = vmul.f32 0.6931472, %v1327_v13 }
 0x2c5   :  { %v647_v36 = vsub.f32 %v1783_v27, %v620_v3  ;;  %v1939_v3 = vsel %vm683_vm1, %v1718_v50, 128 }
 0x2c6   :  { %v590_v63 = vpop.xlane.xlu0 %589  ;;  %v794_v24 = vshra.s32 %v1939_v3, 16 }
 0x2c7   :  { %663 = vst [vmem:[#allocation2 + $0x20] sm:$0xff] %v647_v36  ;;  %v1066_v8 = vmul.f32 %v1226_v53, %v647_v36  ;;  %1328 = vlog2.f32 %v590_v63  ;;  %v1949_v53 = vsel %vm684_vm3, %v1718_v50, 128 }
 0x2c8   :  { %v808_v49 = vshra.s32 %v1949_v53, 16 }
 0x2c9   :  { %v1081_v61 = vadd.f32 %v1080_v54, %v1066_v8  ;;  %v1228_v54 = vsel %vm1020_vm0, 1.0, %v1391_v11 }
 0x2cb   :  { %v592_v1 = vpop.xlane.xlu1 %591 }
 0x2cc   :  { %1330 = vlog2.f32 %v592_v1  ;;  %v751_v1 = vand.u32 65535, %v1775_v16 }
 0x2cd   :  { %v1329_v9 = vpop.eup %1328 }
 0x2ce   :  { %v622_v55 = vmul.f32 0.6931472, %v1329_v9  ;;  %v753_v39 = vcvt.s32.f32 %v751_v1 }
 0x2d0   :  { %v648_v47 = vsub.f32 %v1792_v45, %v622_v55  ;;  %v1959_v55 = vcvt.s32.f32 %v808_v49  ;;  %v2019_v49 = vsel %vm692_vm14, %v1718_v50, 128 }
 0x2d2   :  { %v1331_v14 = vpop.eup %1330  ;;  %664 = vst [vmem:[#allocation2 + $0x28] sm:$0xff] %v648_v47  ;;  %v1067_v27 = vmul.f32 %v1227_v38, %v648_v47  ;;  %v1230_v47 = vsel %vm1022_vm4, 1.0, %v1391_v11 }
 0x2d3   :  { %v624_v7 = vmul.f32 0.6931472, %v1331_v14  ;;  %v594_v56 = vpop.xlane.xlu2 %593  ;;  %v765_v14 = vand.u32 65535, %v1788_v31 }
 0x2d4   :  { %v1082_v0 = vadd.f32 %v1081_v61, %v1067_v27  ;;  %1332 = vlog2.f32 %v594_v56  ;;  %v1951_v61 = vcvt.s32.f32 %v794_v24  ;;  %v1970_v27 = vsel %vm687_vm5, %v1718_v50, 128 }
 0x2d5   :  { %v649_v40 = vsub.f32 %v1810_v22, %v624_v7  ;;  %v758_v7 = vsel %vm757_vm6, %v753_v39, inf  ;;  %v767_v31 = vcvt.s32.f32 %v765_v14  ;;  %v850_v48 = vshra.s32 %v1970_v27, 16 }
 0x2d6   :  { %v1985_v56 = vsel %vm686_vm8, %v1718_v50, 128 }
 0x2d7   :  { %665 = vst [vmem:[#allocation2 + $0x30] sm:$0xff] %v649_v40  ;;  %v1068_v43 = vmul.f32 %v1228_v54, %v649_v40  ;;  %v772_v30 = vsel %vm771_vm9, %v767_v31, inf  ;;  %v1989_v40 = vcvt.s32.f32 %v850_v48  ;;  %v836_v58 = vshra.s32 %v1985_v56, 16 }
 0x2d9   :  { %v1083_v45 = vadd.f32 %v1082_v0, %v1068_v43  ;;  %v786_v0 = vsel %vm785_vm10, %v781_v19, inf  ;;  %v1993_v43 = vsel %vm690_vm11, %v1718_v50, 128 }
 0x2da   :  { %v1333_v13 = vpop.eup %1332 }
 0x2db   :  { %v626_v57 = vmul.f32 0.6931472, %v1333_v13  ;;  %v596_v22 = vpop.xlane.xlu0 %595  ;;  %v2001_v13 = vcvt.s32.f32 %v836_v58 }
 0x2dc   :  { %1334 = vlog2.f32 %v596_v22  ;;  %v1232_v22 = vsel %vm1024_vm12, 1.0, %v1391_v11 }
 0x2dd   :  { %v650_v36 = vsub.f32 %v1817_v5, %v626_v57  ;;  %v892_v57 = vshra.s32 %v1993_v43, 16 }
 0x2df   :  { %666 = vst [vmem:[#allocation2 + $0x38] sm:$0xff] %v650_v36  ;;  %v1069_v63 = vmul.f32 %v1229_v60, %v650_v36  ;;  %v2006_v36 = vsel %vm689_vm13, %v1718_v50, 128  ;;  %v2009_v10 = vcvt.s32.f32 %v892_v57 }
 0x2e0   :  { %v878_v24 = vshra.s32 %v2006_v36, 16 }
 0x2e1   :  { %v1084_v8 = vadd.f32 %v1083_v45, %v1069_v63 }
 0x2e2   :  { %v1335_v26 = vpop.eup %1334 }
 0x2e3   :  { %v628_v2 = vmul.f32 0.6931472, %v1335_v26  ;;  %797 = vmin.xlane.f32.xlu0 %v1951_v61  ;;  %v598_v5 = vpop.xlane.xlu1 %597 }
 0x2e4   :  { %1336 = vlog2.f32 %v598_v5 }
 0x2e5   :  { %v651_v9 = vsub.f32 %v1824_v12, %v628_v2  ;;  %v920_v2 = vshra.s32 %v2019_v49, 16 }
 0x2e7   :  { %667 = vst [vmem:[#allocation2 + $0x40] sm:$0xff] %v651_v9  ;;  %v1070_v38 = vmul.f32 %v1230_v47, %v651_v9  ;;  %811 = vmin.xlane.f32.xlu2 %v1959_v55  ;;  %v2023_v5 = vcvt.s32.f32 %v920_v2  ;;  %v720_v9 = vcvt.f32.s32 %v1870_v52 }
 0x2e9   :  { %v1085_v16 = vadd.f32 %v1084_v8, %v1070_v38  ;;  %745 = vmin.xlane.f32.xlu1 %v1895_v6  ;;  %v2016_v8 = vcvt.s32.f32 %v878_v24  ;;  %v721_v39 = vshll.u32 %v720_v9, 16 }
 0x2ea   :  { %v1337_v12 = vpop.eup %1336 }
 0x2eb   :  { %v630_v21 = vmul.f32 0.6931472, %v1337_v12  ;;  %v600_v29 = vpop.xlane.xlu2 %599  ;;  %759 = vmin.xlane.f32.xlu0 %v758_v7 }
 0x2ec   :  { %1338 = vlog2.f32 %v600_v29  ;;  %v735_v29 = vshll.u32 %v734_v32, 16 }
 0x2ed   :  { %v652_v6 = vsub.f32 %v1831_v23, %v630_v21 }
 0x2ef   :  { %668 = vst [vmem:[#allocation2 + $0x48] sm:$0xff] %v652_v6  ;;  %v1071_v20 = vmul.f32 %v1231_v4, %v652_v6  ;;  %773 = vmin.xlane.f32.xlu2 %v772_v30  ;;  %v2232_v30 = vld [vmem:[#allocation16_spill] sm:$0xff] }
 0x2f1   :  { %v1086_v23 = vadd.f32 %v1085_v16, %v1071_v20  ;;  %787 = vmin.xlane.f32.xlu1 %v786_v0  ;;  %v2233_v0 = vld [vmem:[#allocation10_spill] sm:$0xff] }
 0x2f2   :  { %v1339_v54 = vpop.eup %1338  ;;  %vm1025_vm0 = vcmp.eq.s32.totalorder %v1718_v50, %v2233_v0 }
 0x2f3   :  { %v632_v46 = vmul.f32 0.6931472, %v1339_v54  ;;  %853 = vmin.xlane.f32.xlu0 %v1989_v40  ;;  %v602_v25 = vpop.xlane.xlu0 %601  ;;  %v1233_v58 = vsel %vm1025_vm0, 1.0, %v1391_v11 }
 0x2f4   :  { %1340 = vlog2.f32 %v602_v25 }
 0x2f5   :  { %v653_v45 = vsub.f32 %v1838_v33, %v632_v46 }
 0x2f7   :  { %669 = vst [vmem:[#allocation2 + $0x50] sm:$0xff] %v653_v45  ;;  %v1072_v59 = vmul.f32 %v1232_v22, %v653_v45  ;;  %839 = vmin.xlane.f32.xlu2 %v2001_v13 }
 0x2f9   :  { %v1087_v42 = vadd.f32 %v1086_v23, %v1072_v59  ;;  %v2234_v23 = vld [vmem:[#allocation12_spill] sm:$0xff] }
 0x2fa   :  { %v1341_v60 = vpop.eup %1340  ;;  %vm1026_vm1 = vcmp.eq.s32.totalorder %v1718_v50, %v2234_v23 }
 0x2fb   :  { %v634_v33 = vmul.f32 0.6931472, %v1341_v60  ;;  %895 = vmin.xlane.f32.xlu0 %v2009_v10  ;;  %v1234_v25 = vsel %vm1026_vm1, 1.0, %v1391_v11 }
 0x2fd   :  { %v654_v63 = vsub.f32 %v1845_v35, %v634_v33 }
 0x2ff   :  { %670 = vst [vmem:[#allocation2 + $0x58] sm:$0xff] %v654_v63  ;;  %881 = vmin.xlane.f32.xlu2 %v2016_v8  ;;  %v1073_v46 = vmul.f32 %v1233_v58, %v654_v63 }
 0x301   :  { %v604_v26 = vpop.xlane.xlu1 %603 }
 0x302   :  { %1342 = vlog2.f32 %v604_v26 }
 0x307   :  { %923 = vmin.xlane.f32.xlu2 %v2023_v5 }
 0x308   :  { %v1343_v28 = vpop.eup %1342 }
 0x309   :  { %v636_v62 = vmul.f32 0.6931472, %v1343_v28  ;;  %v606_v1 = vpop.xlane.xlu2 %605  ;;  %v2235_v28 = vld [vmem:[#allocation13_spill] sm:$0xff] }
 0x30a   :  { %1344 = vlog2.f32 %v606_v1 }
 0x30b   :  { %v655_v35 = vsub.f32 %v1852_v15, %v636_v62  ;;  %v2236_v62 = vld [vmem:[#allocation8_spill] sm:$0xff] }
 0x30c   :  { %vm685_vm5 = vcmp.eq.f32.partialorder %v2236_v62, %v2235_v28  ;;  %v877_v28 = vand.u32 65535, %v2006_v36 }
 0x30d   :  { %671 = vst [vmem:[#allocation2 + $0x60] sm:$0xff] %v655_v35  ;;  %v1074_v57 = vmul.f32 %v1234_v25, %v655_v35  ;;  %v2055_v9 = vsel %vm685_vm5, %v1718_v50, 128 }
 0x310   :  { %v1345_v47 = vpop.eup %1344  ;;  %v718_v38 = vpop.xlane.xlu0 %717 }
 0x311   :  { %v638_v14 = vmul.f32 0.6931472, %v1345_v47  ;;  %v719_v16 = vcvt.f32.s32 %v718_v38  ;;  %v822_v47 = vshra.s32 %v2055_v9, 16  ;;  %v2237_v38 = vld [vmem:[#allocation14_spill] sm:$0xff] }
 0x313   :  { %v656_v12 = vsub.f32 %v1859_v18, %v638_v14  ;;  %v722_v7 = vadd.s32 %v721_v39, %v719_v16  ;;  %v2238_v39 = vld [vmem:[#allocation9_spill] sm:$0xff]  ;;  %v2060_v14 = vcvt.s32.f32 %v822_v47 }
 0x314   :  { %vm688_vm6 = vcmp.eq.f32.partialorder %v2238_v39, %v2237_v38 }
 0x315   :  { %672 = vst [vmem:[#allocation2 + $0x68] sm:$0xff] %v656_v12 }
 0x316   :  { %934 = vst.msk [vmem:[%s2214_s9] sm:$0xff] %vm933_vm15, %v722_v7  ;;  %v2240_v7 = vld [vmem:[#allocation11_spill] sm:$0xff] }
 0x318   :  { %v608_v15 = vpop.xlane.xlu0 %607 }
 0x319   :  { %1346 = vlog2.f32 %v608_v15  ;;  %v732_v52 = vpop.xlane.xlu2 %731  ;;  %v610_v21 = vpop.xlane.xlu1 %609 }
 0x31a   :  { %v733_v31 = vcvt.f32.s32 %v732_v52  ;;  %1348 = vlog2.f32 %v610_v21 }
 0x31c   :  { %v736_v6 = vadd.s32 %v735_v29, %v733_v31  ;;  %v793_v29 = vand.u32 65535, %v1939_v3 }
 0x31e   :  { %935 = vst.msk [vmem:[%s2214_s9 + $0x8] sm:$0xff] %vm933_vm15, %v736_v6  ;;  %v795_v6 = vcvt.s32.f32 %v793_v29 }
 0x31f   :  { %v1347_v18 = vpop.eup %1346 }
 0x320   :  { %v1349_v44 = vpop.eup %1348  ;;  %v640_v48 = vmul.f32 0.6931472, %v1347_v18  ;;  %v807_v18 = vand.u32 65535, %v1949_v53 }
 0x321   :  { %v642_v4 = vmul.f32 0.6931472, %v1349_v44  ;;  %v1013_v45 = vpop.permute.xlu2 %1012  ;;  %v748_v44 = vcvt.f32.s32 %v1891_v37 }
 0x322   :  { %v657_v19 = vsub.f32 %v2232_v30, %v640_v48  ;;  %vm1029_vm3 = vcmp.eq.s32.totalorder %v1718_v50, %v1013_v45  ;;  %v762_v30 = vcvt.f32.s32 %v1901_v34 }
 0x323   :  { %v658_v20 = vsub.f32 %v1876_v41, %v642_v4  ;;  %v1088_v41 = vadd.f32 %v1087_v42, %v1073_v46  ;;  %v1237_v63 = vsel %vm1029_vm3, 1.0, %v1391_v11  ;;  %v809_v4 = vcvt.s32.f32 %v807_v18 }
 0x324   :  { %673 = vst [vmem:[#allocation2 + $0x70] sm:$0xff] %v657_v19  ;;  %v763_v23 = vshll.u32 %v762_v30, 16  ;;  %v849_v46 = vand.u32 65535, %v1970_v27 }
 0x325   :  { %674 = vst [vmem:[#allocation2 + $0x78] sm:$0xff] %v658_v20  ;;  %v1089_v33 = vadd.f32 %v1088_v41, %v1074_v57  ;;  %v1077_v1 = vmul.f32 %v1237_v63, %v658_v20  ;;  %v749_v20 = vshll.u32 %v748_v44, 16 }
 0x326   :  { %1117 = dma.vmem_to_hbm [thread:$0]  %s1110_s12, 2048, %s1112_s15, [#allocation3], %s1393_s16, %s1393_s16, %s1394_s17  }
 0x32b   :  { %v1010_v54 = vpop.permute.xlu0 %1009 }
 0x32c   :  { %vm1028_vm2 = vcmp.eq.s32.totalorder %v1718_v50, %v1010_v54  ;;  %v790_v54 = vcvt.f32.s32 %v1920_v51 }
 0x32d   :  { %v1236_v59 = vsel %vm1028_vm2, 1.0, %v1391_v11 }
 0x32e   :  { %v1076_v26 = vmul.f32 %v1236_v59, %v657_v19  ;;  %v791_v57 = vshll.u32 %v790_v54, 16  ;;  %v851_v59 = vcvt.s32.f32 %v849_v46 }
 0x331   :  { %v1007_v22 = vpop.permute.xlu1 %1006 }
 0x332   :  { %vm1027_vm4 = vcmp.eq.s32.totalorder %v1718_v50, %v1007_v22 }
 0x333   :  { %v1235_v24 = vsel %vm1027_vm4, 1.0, %v1391_v11  ;;  %v2063_v11 = vsel %vm688_vm6, %v1718_v50, 128 }
 0x334   :  { %v1075_v60 = vmul.f32 %v1235_v24, %v656_v12  ;;  %v864_v16 = vshra.s32 %v2063_v11, 16  ;;  %v2239_v12 = vld [vmem:[#allocation15_spill] sm:$0xff]  ;;  %v835_v24 = vand.u32 65535, %v1985_v56  ;;  %v891_v56 = vand.u32 65535, %v1993_v43 }
 0x335   :  { %vm691_vm7 = vcmp.eq.f32.partialorder %v2240_v7, %v2239_v12 }
 0x336   :  { %v1090_v2 = vadd.f32 %v1089_v33, %v1075_v60  ;;  %v2069_v32 = vcvt.s32.f32 %v864_v16  ;;  %v2072_v15 = vsel %vm691_vm7, %v1718_v50, 128  ;;  %v837_v63 = vcvt.s32.f32 %v835_v24 }
 0x337   :  { %v906_v52 = vshra.s32 %v2072_v15, 16  ;;  %v821_v16 = vand.u32 65535, %v2055_v9 }
 0x338   :  { %v1091_v35 = vadd.f32 %v1090_v2, %v1076_v26 }
 0x339   :  { %v2076_v21 = vcvt.s32.f32 %v906_v52  ;;  %v823_v52 = vcvt.s32.f32 %v821_v16 }
 0x33a   :  { %v1092_v42 = vadd.f32 %v1091_v35, %v1077_v1  ;;  %v879_v35 = vcvt.s32.f32 %v877_v28 }
 0x33c   :  { %1093 = vadd.xlane.f32.xlu1 %v1092_v42 }
 0x344   :  { %825 = vmin.xlane.f32.xlu1 %v2060_v14 }
 0x34c   :  { %867 = vmin.xlane.f32.xlu1 %v2069_v32 }
 0x354   :  { %909 = vmin.xlane.f32.xlu1 %v2076_v21 }
 0x356   :  { %v2080_v31 = vpop.xlane.xlu0 %797 }
 0x357   :  { %vm799_vm8 = vcmp.eq.f32.partialorder %v1951_v61, %v2080_v31  ;;  %v776_v61 = vcvt.f32.s32 %v1924_v17 }
 0x358   :  { %v800_v50 = vsel %vm799_vm8, %v795_v6, inf }
 0x359   :  { %801 = vmin.xlane.f32.xlu0 %v800_v50  ;;  %v777_v25 = vshll.u32 %v776_v61, 16 }
 0x35a   :  { %v2086_v48 = vpop.xlane.xlu2 %811 }
 0x35b   :  { %vm813_vm9 = vcmp.eq.f32.partialorder %v1959_v55, %v2086_v48 }
 0x35c   :  { %v746_v3 = vpop.xlane.xlu1 %745  ;;  %v814_v19 = vsel %vm813_vm9, %v809_v4, inf }
 0x35d   :  { %v747_v0 = vcvt.f32.s32 %v746_v3  ;;  %815 = vmin.xlane.f32.xlu1 %v814_v19  ;;  %v818_v19 = vcvt.f32.s32 %v2086_v48 }
 0x35e   :  { %v760_v53 = vpop.xlane.xlu0 %759 }
 0x35f   :  { %v750_v58 = vadd.s32 %v749_v20, %v747_v0  ;;  %v761_v37 = vcvt.f32.s32 %v760_v53  ;;  %v819_v53 = vshll.u32 %v818_v19, 16 }
 0x361   :  { %936 = vst.msk [vmem:[%s2214_s9 + $0x10] sm:$0xff] %vm933_vm15, %v750_v58  ;;  %v764_v34 = vadd.s32 %v763_v23, %v761_v37 }
 0x362   :  { %v774_v55 = vpop.xlane.xlu2 %773 }
 0x363   :  { %937 = vst.msk [vmem:[%s2214_s9 + $0x18] sm:$0xff] %vm933_vm15, %v764_v34  ;;  %v775_v17 = vcvt.f32.s32 %v774_v55 }
 0x364   :  { %v788_v45 = vpop.xlane.xlu1 %787 }
 0x365   :  { %v778_v22 = vadd.s32 %v777_v25, %v775_v17  ;;  %v789_v51 = vcvt.f32.s32 %v788_v45 }
 0x366   :  { %v2102_v41 = vpop.xlane.xlu0 %853 }
 0x367   :  { %938 = vst.msk [vmem:[%s2214_s9 + $0x20] sm:$0xff] %vm933_vm15, %v778_v22  ;;  %v792_v27 = vadd.s32 %v791_v57, %v789_v51  ;;  %vm855_vm10 = vcmp.eq.f32.partialorder %v1989_v40, %v2102_v41  ;;  %v893_v40 = vcvt.s32.f32 %v891_v56 }
 0x368   :  { %v856_v60 = vsel %vm855_vm10, %v851_v59, inf }
 0x369   :  { %939 = vst.msk [vmem:[%s2214_s9 + $0x28] sm:$0xff] %vm933_vm15, %v792_v27  ;;  %857 = vmin.xlane.f32.xlu1 %v856_v60 }
 0x36a   :  { %v2115_v33 = vpop.xlane.xlu2 %839 }
 0x36b   :  { %vm841_vm11 = vcmp.eq.f32.partialorder %v2001_v13, %v2115_v33  ;;  %v919_v13 = vand.u32 65535, %v2019_v49  ;;  %v846_v58 = vcvt.f32.s32 %v2115_v33 }
 0x36c   :  { %v842_v26 = vsel %vm841_vm11, %v837_v63, inf }
 0x36d   :  { %843 = vmin.xlane.f32.xlu0 %v842_v26  ;;  %v921_v47 = vcvt.s32.f32 %v919_v13  ;;  %v847_v55 = vshll.u32 %v846_v58, 16 }
 0x36e   :  { %v2120_v2 = vpop.xlane.xlu0 %895 }
 0x36f   :  { %vm897_vm12 = vcmp.eq.f32.partialorder %v2009_v10, %v2120_v2  ;;  %v902_v46 = vcvt.f32.s32 %v2120_v2 }
 0x370   :  { %v898_v62 = vsel %vm897_vm12, %v893_v40, inf }
 0x371   :  { %899 = vmin.xlane.f32.xlu1 %v898_v62  ;;  %v903_v57 = vshll.u32 %v902_v46, 16 }
 0x372   :  { %v2125_v1 = vpop.xlane.xlu2 %881 }
 0x373   :  { %vm883_vm13 = vcmp.eq.f32.partialorder %v2016_v8, %v2125_v1  ;;  %v888_v22 = vcvt.f32.s32 %v2125_v1 }
 0x374   :  { %v884_v43 = vsel %vm883_vm13, %v879_v35, inf }
 0x375   :  { %885 = vmin.xlane.f32.xlu0 %v884_v43  ;;  %v889_v24 = vshll.u32 %v888_v22, 16 }
 0x37a   :  { %v2130_v42 = vpop.xlane.xlu2 %923 }
 0x37b   :  { %vm925_vm14 = vcmp.eq.f32.partialorder %v2023_v5, %v2130_v42  ;;  %v863_v5 = vand.u32 65535, %v2063_v11  ;;  %v930_v33 = vcvt.f32.s32 %v2130_v42 }
 0x37c   :  { %v926_v36 = vsel %vm925_vm14, %v921_v47, inf }
 0x37d   :  { %927 = vmin.xlane.f32.xlu0 %v926_v36  ;;  %v865_v50 = vcvt.s32.f32 %v863_v5  ;;  %v931_v56 = vshll.u32 %v930_v33, 16 }
 0x3af   :  { %v1094_v10 = vpop.xlane.xlu1 %1093 }
 0x3b0   :  { %v1095_v38 = vrot.slane %v1094_v10, 4 }
 0x3b2   :  { %v1096_v39 = vadd.f32 %v1095_v38, %v1094_v10 }
 0x3b4   :  { %v1097_v12 = vrot.slane %v1096_v39, 2 }
 0x3b6   :  { %v1098_v7 = vadd.f32 %v1097_v12, %v1096_v39 }
 0x3b7   :  { %v2135_v8 = vpop.xlane.xlu1 %825 }
 0x3b8   :  { %vm827_vm0 = vcmp.eq.f32.partialorder %v2060_v14, %v2135_v8  ;;  %v1099_v49 = vrot.slane %v1098_v7, 1  ;;  %v905_v14 = vand.u32 65535, %v2072_v15  ;;  %v832_v40 = vcvt.f32.s32 %v2135_v8 }
 0x3b9   :  { %v828_v29 = vsel %vm827_vm0, %v823_v52, inf }
 0x3ba   :  { %829 = vmin.xlane.f32.xlu2 %v828_v29  ;;  %v1100_v6 = vadd.f32 %v1099_v49, %v1098_v7  ;;  %v907_v44 = vcvt.s32.f32 %v905_v14  ;;  %v833_v62 = vshll.u32 %v832_v40, 16 }
 0x3bc   :  { %1272 = vpush %v1100_v6 }
 0x3bf   :  { %v2140_v18 = vpop.xlane.xlu1 %867 }
 0x3c0   :  { %vm869_vm1 = vcmp.eq.f32.partialorder %v2069_v32, %v2140_v18  ;;  %v804_v32 = vcvt.f32.s32 %v2080_v31  ;;  %v874_v43 = vcvt.f32.s32 %v2140_v18 }
 0x3c1   :  { %v870_v9 = vsel %vm869_vm1, %v865_v50, inf }
 0x3c2   :  { %871 = vmin.xlane.f32.xlu2 %v870_v9  ;;  %v805_v3 = vshll.u32 %v804_v32, 16  ;;  %v875_v42 = vshll.u32 %v874_v43, 16 }
 0x3c7   :  { %v2148_v11 = vpop.xlane.xlu1 %909 }
 0x3c8   :  { %vm911_vm2 = vcmp.eq.f32.partialorder %v2076_v21, %v2148_v11  ;;  %v860_v21 = vcvt.f32.s32 %v2102_v41  ;;  %v916_v10 = vcvt.f32.s32 %v2148_v11 }
 0x3c9   :  { %v912_v4 = vsel %vm911_vm2, %v907_v44, inf }
 0x3ca   :  { %913 = vmin.xlane.f32.xlu2 %v912_v4  ;;  %v861_v48 = vshll.u32 %v860_v21, 16  ;;  %v917_v39 = vshll.u32 %v916_v10, 16 }
 0x3cc   :  { %v802_v30 = vpop.xlane.xlu0 %801 }
 0x3cd   :  { %v803_v20 = vcvt.f32.s32 %v802_v30 }
 0x3cf   :  { %v806_v0 = vadd.s32 %v805_v3, %v803_v20 }
 0x3d0   :  { %v816_v15 = vpop.xlane.xlu1 %815 }
 0x3d1   :  { %940 = vst.msk [vmem:[%s2214_s9 + $0x30] sm:$0xff] %vm933_vm15, %v806_v0  ;;  %v817_v23 = vcvt.f32.s32 %v816_v15 }
 0x3d3   :  { %v820_v61 = vadd.s32 %v819_v53, %v817_v23 }
 0x3d5   :  { %941 = vst.msk [vmem:[%s2214_s9 + $0x38] sm:$0xff] %vm933_vm15, %v820_v61 }
 0x3dc   :  { %v858_v31 = vpop.xlane.xlu1 %857 }
 0x3dd   :  { %v859_v37 = vcvt.f32.s32 %v858_v31 }
 0x3df   :  { %v862_v54 = vadd.s32 %v861_v48, %v859_v37 }
 0x3e0   :  { %v844_v34 = vpop.xlane.xlu0 %843 }
 0x3e1   :  { %944 = vst.msk [vmem:[%s2214_s9 + $0x50] sm:$0xff] %vm933_vm15, %v862_v54  ;;  %v845_v25 = vcvt.f32.s32 %v844_v34 }
 0x3e3   :  { %v848_v17 = vadd.s32 %v847_v55, %v845_v25 }
 0x3e4   :  { %v900_v45 = vpop.xlane.xlu1 %899 }
 0x3e5   :  { %943 = vst.msk [vmem:[%s2214_s9 + $0x48] sm:$0xff] %vm933_vm15, %v848_v17  ;;  %v901_v51 = vcvt.f32.s32 %v900_v45 }
 0x3e7   :  { %v904_v41 = vadd.s32 %v903_v57, %v901_v51 }
 0x3e8   :  { %v886_v59 = vpop.xlane.xlu0 %885 }
 0x3e9   :  { %947 = vst.msk [vmem:[%s2214_s9 + $0x68] sm:$0xff] %vm933_vm15, %v904_v41  ;;  %v887_v27 = vcvt.f32.s32 %v886_v59 }
 0x3eb   :  { %v890_v60 = vadd.s32 %v889_v24, %v887_v27 }
 0x3ed   :  { %946 = vst.msk [vmem:[%s2214_s9 + $0x60] sm:$0xff] %vm933_vm15, %v890_v60  ;;  %s1273_s24 = spop %1272 }
 0x3ee   :  { %s1102_s25 = ssub.f32 0.0, %s1273_s24 }
 0x3f0   :  { %1104 = sst [smem:[#allocation5]] %s1102_s25  ;;  %v928_v63 = vpop.xlane.xlu0 %927 }
 0x3f1   :  { %v929_v26 = vcvt.f32.s32 %v928_v63  ;;  %1128 = dma.smem_to_hbm %s1395_s26, 16, %s1126_s0, [#allocation4]  }
 0x3f3   :  { %v932_v2 = vadd.s32 %v931_v56, %v929_v26 }
 0x3f5   :  { %949 = vst.msk [vmem:[%s2214_s9 + $0x78] sm:$0xff] %vm933_vm15, %v932_v2 }
 0x42d   :  { %v830_v28 = vpop.xlane.xlu2 %829 }
 0x42e   :  { %v831_v1 = vcvt.f32.s32 %v830_v28 }
 0x430   :  { %v834_v35 = vadd.s32 %v833_v62, %v831_v1 }
 0x432   :  { %942 = vst.msk [vmem:[%s2214_s9 + $0x40] sm:$0xff] %vm933_vm15, %v834_v35 }
 0x435   :  { %v872_v13 = vpop.xlane.xlu2 %871 }
 0x436   :  { %v873_v47 = vcvt.f32.s32 %v872_v13 }
 0x438   :  { %v876_v36 = vadd.s32 %v875_v42, %v873_v47 }
 0x43a   :  { %945 = vst.msk [vmem:[%s2214_s9 + $0x58] sm:$0xff] %vm933_vm15, %v876_v36 }
 0x43d   :  { %v914_v38 = vpop.xlane.xlu2 %913 }
 0x43e   :  { %v915_v16 = vcvt.f32.s32 %v914_v38 }
 0x440   :  { %v918_v12 = vadd.s32 %v917_v39, %v915_v16 }
 0x442   :  { %948 = vst.msk [vmem:[%s2214_s9 + $0x70] sm:$0xff] %vm933_vm15, %v918_v12 }
 0x443   :  { %1386 = dma.done.wait [#allocation3], 2048  }
 0x444   :  { %1387 = vsyncadd [#allocation3], 4294965248 }
 0x445   :  { %1388 = dma.done.wait [#allocation4], 16  }
 0x446   :  { %1389 = vsyncadd [#allocation4], 4294967280 }
 0x447   :  { %1139 = sfence }
 0x448   :  { %1140 = vsyncpa [#allocation3], 1 }
 0x449   :  { %1141 = vsyncpa [#allocation4], 1 }

</bundles_post_ra>
